<compile_context>
chip_gen: v7x
topology: tpu7x:2x2x1
jax: 0.10.0
libtpu: 0.0.40
codegen_flags: <defaults>
</compile_context>

<pallas_src>
import functools

import jax
import jax.numpy as jnp
from jax.experimental import pallas as pl
from jax.experimental.pallas import tpu as pltpu


def _round_up(x, m):
    return ((x + m - 1) // m) * m


def vae_kernel(x_ref, eps_ref,
               w1_ref, b1_ref,
               wh_ref, bh_ref,
               w2_ref, b2_ref,
               w3_ref, b3_ref,
               recon_ref, mulv_ref,
               *, latent_size):
    # ---- encode: h = relu(x @ W1 + b1) ------------------------------------
    x = x_ref[...]                                              # bf16 [TB, in]
    h = jnp.dot(x, w1_ref[...],
                preferred_element_type=jnp.float32) + b1_ref[...]
    h = jnp.maximum(h, 0.0)                                     # f32 [TB, 128]

    # ---- fused mu|logvar head: one (hidden, 2*latent) matmul ---------------
    mulv = jnp.dot(h.astype(jnp.bfloat16), wh_ref[...],
                   preferred_element_type=jnp.float32) + bh_ref[...]
    mu = mulv[:, :latent_size]
    logvar = mulv[:, latent_size:]

    # ---- reparameterize: z = mu + eps * exp(0.5 * logvar)  (all f32) -------
    std = jnp.exp(0.5 * logvar)
    z = mu + eps_ref[...] * std

    # ---- decode: recon = sigmoid(relu(z @ W2 + b2) @ W3 + b3) --------------
    h2 = jnp.dot(z.astype(jnp.bfloat16), w2_ref[...],
                 preferred_element_type=jnp.float32) + b2_ref[...]
    h2 = jnp.maximum(h2, 0.0)
    logits = jnp.dot(h2.astype(jnp.bfloat16), w3_ref[...],
                     preferred_element_type=jnp.float32) + b3_ref[...]
    # sigmoid via EUP exp + approximate reciprocal (frees the VALU slot)
    recon = pl.reciprocal(1.0 + jnp.exp(-logits), approx=True)

    recon_ref[...] = recon
    mulv_ref[...] = mulv                                        # packed mu|logvar


def vae_forward(x, eps, params, *, tile_b=256):
    """x: [B, input_size] f32, eps: [B, latent_size] f32.
    params: dict of (in, out) weights and (1, out) biases (f32).
    Returns (recon, mu, logvar), all f32."""
    B, input_size = x.shape
    latent_size = eps.shape[1]
    hidden = params["w1"].shape[1]

    # Fuse the mu / logvar projection weights into one head.
    w_head = jnp.concatenate([params["w_mu"], params["w_logvar"]], axis=1)
    b_head = jnp.concatenate([params["b_mu"], params["b_logvar"]], axis=1)

    # bf16 matmul operands (f32 accumulation in-kernel); biases stay f32.
    x_bf = x.astype(jnp.bfloat16)
    w1 = params["w1"].astype(jnp.bfloat16)
    wh = w_head.astype(jnp.bfloat16)
    w2 = params["w2"].astype(jnp.bfloat16)
    w3 = params["w3"].astype(jnp.bfloat16)
    b1, b2, b3 = params["b1"], params["b2"], params["b3"]

    # Batch tiling: multiple of 8 (f32 sublane); sized well under v7x's 64 MiB VMEM.
    tile_b = max(8, min(tile_b, _round_up(B, 8)))
    Bp = _round_up(B, tile_b)
    if Bp != B:
        pad = Bp - B
        x_bf = jnp.pad(x_bf, ((0, pad), (0, 0)))
        eps = jnp.pad(eps, ((0, pad), (0, 0)))

    grid = (Bp // tile_b,)
    batch_map = lambda i: (i, 0)      # batch-tiled operands
    const_map = lambda i: (0, 0)      # weights/biases: VMEM-resident across steps

    in_specs = [
        pl.BlockSpec((tile_b, input_size), batch_map),        # x (bf16)
        pl.BlockSpec((tile_b, latent_size), batch_map),       # eps (f32)
        pl.BlockSpec((input_size, hidden), const_map),        # w1
        pl.BlockSpec((1, hidden), const_map),                 # b1
        pl.BlockSpec((hidden, 2 * latent_size), const_map),   # w_head (mu|logvar)
        pl.BlockSpec((1, 2 * latent_size), const_map),        # b_head
        pl.BlockSpec((latent_size, hidden), const_map),       # w2
        pl.BlockSpec((1, hidden), const_map),                 # b2
        pl.BlockSpec((hidden, input_size), const_map),        # w3
        pl.BlockSpec((1, input_size), const_map),             # b3
    ]
    out_specs = (
        pl.BlockSpec((tile_b, input_size), batch_map),        # recon
        pl.BlockSpec((tile_b, 2 * latent_size), batch_map),   # packed mu|logvar
    )

    # Advisory cost estimate so XLA schedules this sensibly next to other ops.
    flops = 2 * Bp * (input_size * hidden + hidden * 2 * latent_size
                      + latent_size * hidden + hidden * input_size)
    transcendentals = Bp * (latent_size + input_size)  # exp(0.5*logvar) + sigmoid exp
    bytes_accessed = (
        Bp * input_size * 2                      # x (bf16)
        + Bp * latent_size * 4                   # eps
        + (w1.size + wh.size + w2.size + w3.size) * 2
        + (b1.size + b_head.size + b2.size + b3.size) * 4
        + Bp * input_size * 4                    # recon
        + Bp * 2 * latent_size * 4               # mu|logvar
    )

    recon_p, mulv_p = pl.pallas_call(
        functools.partial(vae_kernel, latent_size=latent_size),
        out_shape=(
            jax.ShapeDtypeStruct((Bp, input_size), jnp.float32),
            jax.ShapeDtypeStruct((Bp, 2 * latent_size), jnp.float32),
        ),
        grid=grid,
        in_specs=in_specs,
        out_specs=out_specs,
        compiler_params=pltpu.CompilerParams(
            dimension_semantics=("parallel",)),
        cost_estimate=pl.CostEstimate(
            flops=int(flops),
            transcendentals=int(transcendentals),
            bytes_accessed=int(bytes_accessed)),
    )(x_bf, eps, w1, b1, wh, b_head, w2, b2, w3, b3)

    recon = recon_p[:B]
    mu = mulv_p[:B, :latent_size]
    logvar = mulv_p[:B, latent_size:]
    return recon, mu, logvar


def init_params(key, input_size, latent_size, hidden=128):
    """Deterministic init mimicking nn.Linear's U(-1/sqrt(fan_in), 1/sqrt(fan_in)).
    Weights stored as (in_features, out_features); biases as (1, out_features)."""
    def linear(key, fan_in, fan_out):
        kw, kb = jax.random.split(key)
        bound = 1.0 / jnp.sqrt(fan_in)
        w = jax.random.uniform(kw, (fan_in, fan_out), jnp.float32, -bound, bound)
        b = jax.random.uniform(kb, (1, fan_out), jnp.float32, -bound, bound)
        return w, b

    k1, k2, k3, k4, k5 = jax.random.split(key, 5)
    w1, b1 = linear(k1, input_size, hidden)
    w_mu, b_mu = linear(k2, hidden, latent_size)
    w_lv, b_lv = linear(k3, hidden, latent_size)
    w2, b2 = linear(k4, latent_size, hidden)
    w3, b3 = linear(k5, hidden, input_size)
    return {
        "w1": w1, "b1": b1,
        "w_mu": w_mu, "b_mu": b_mu,
        "w_logvar": w_lv, "b_logvar": b_lv,
        "w2": w2, "b2": b2,
        "w3": w3, "b3": b3,
    }


if __name__ == "__main__":
    # Small-but-tiled shapes: batch 512 with TILE_B=256 -> 2 grid steps.
    batch = 512
    input_size = 64
    latent_size = 16

    key = jax.random.PRNGKey(0)
    k_x, k_eps, k_params = jax.random.split(key, 3)

    x = jax.random.normal(k_x, (batch, input_size), jnp.float32)
    # TODO(synk): eps could be generated in-kernel via pltpu.prng_seed/prng_random_bits;
    # kept host-side for bitwise-deterministic parity with torch.randn_like.
    eps = jax.random.normal(k_eps, (batch, latent_size), jnp.float32)
    params = init_params(k_params, input_size, latent_size)

    recon, mu, logvar = vae_forward(x, eps, params, tile_b=256)
    jax.block_until_ready((recon, mu, logvar))

    # Pure-JAX reference using the same bf16-input / f32-accumulate matmul math.
    xb = x.astype(jnp.bfloat16)
    w1 = params["w1"].astype(jnp.bfloat16)
    wmu = params["w_mu"].astype(jnp.bfloat16)
    wlv = params["w_logvar"].astype(jnp.bfloat16)
    w2 = params["w2"].astype(jnp.bfloat16)
    w3 = params["w3"].astype(jnp.bfloat16)

    h = jnp.maximum(
        jnp.dot(xb, w1, preferred_element_type=jnp.float32) + params["b1"], 0.0)
    hb = h.astype(jnp.bfloat16)
    mu_r = jnp.dot(hb, wmu, preferred_element_type=jnp.float32) + params["b_mu"]
    lv_r = jnp.dot(hb, wlv, preferred_element_type=jnp.float32) + params["b_logvar"]
    z_r = mu_r + eps * jnp.exp(0.5 * lv_r)
    h2 = jnp.maximum(
        jnp.dot(z_r.astype(jnp.bfloat16), w2,
                preferred_element_type=jnp.float32) + params["b2"], 0.0)
    logits = jnp.dot(h2.astype(jnp.bfloat16), w3,
                     preferred_element_type=jnp.float32) + params["b3"]
    recon_r = jax.nn.sigmoid(logits)

    assert jnp.allclose(mu, mu_r, atol=1e-2, rtol=1e-2)
    assert jnp.allclose(logvar, lv_r, atol=1e-2, rtol=1e-2)
    assert jnp.allclose(recon, recon_r, atol=1e-2, rtol=1e-2)

    print("KERNEL_OK")
</pallas_src>

<mosaic_0001>
module attributes {stable_mosaic.version = 11 : i64} {
  func.func @vae_kernel(%arg0: i32, %arg1: memref<256x64xbf16, #tpu.memory_space<vmem>>, %arg2: memref<256x16xf32, #tpu.memory_space<vmem>>, %arg3: memref<64x128xbf16, #tpu.memory_space<vmem>>, %arg4: memref<1x128xf32, #tpu.memory_space<vmem>>, %arg5: memref<128x32xbf16, #tpu.memory_space<vmem>>, %arg6: memref<1x32xf32, #tpu.memory_space<vmem>>, %arg7: memref<16x128xbf16, #tpu.memory_space<vmem>>, %arg8: memref<1x128xf32, #tpu.memory_space<vmem>>, %arg9: memref<128x64xbf16, #tpu.memory_space<vmem>>, %arg10: memref<1x64xf32, #tpu.memory_space<vmem>>, %arg11: memref<256x64xf32, #tpu.memory_space<vmem>>, %arg12: memref<256x32xf32, #tpu.memory_space<vmem>>) attributes {dimension_semantics = [#tpu.dimension_semantics<parallel>], iteration_bounds = array<i64: 2>, scalar_prefetch = 0 : i64, scratch_operands = 0 : i64, tpu.core_type = #tpu.core_type<tc>, window_params = [{transform_indices = @transform_0, window_bounds = array<i64: 256, 64>}, {transform_indices = @transform_1, window_bounds = array<i64: 256, 16>}, {pipeline_mode = #tpu.pipeline_mode<synchronous>, transform_indices = @transform_2, window_bounds = array<i64: 64, 128>}, {pipeline_mode = #tpu.pipeline_mode<synchronous>, transform_indices = @transform_3, window_bounds = array<i64: 1, 128>}, {pipeline_mode = #tpu.pipeline_mode<synchronous>, transform_indices = @transform_4, window_bounds = array<i64: 128, 32>}, {pipeline_mode = #tpu.pipeline_mode<synchronous>, transform_indices = @transform_5, window_bounds = array<i64: 1, 32>}, {pipeline_mode = #tpu.pipeline_mode<synchronous>, transform_indices = @transform_6, window_bounds = array<i64: 16, 128>}, {pipeline_mode = #tpu.pipeline_mode<synchronous>, transform_indices = @transform_7, window_bounds = array<i64: 1, 128>}, {pipeline_mode = #tpu.pipeline_mode<synchronous>, transform_indices = @transform_8, window_bounds = array<i64: 128, 64>}, {pipeline_mode = #tpu.pipeline_mode<synchronous>, transform_indices = @transform_9, window_bounds = array<i64: 1, 64>}, {transform_indices = @transform_10, window_bounds = array<i64: 256, 64>}, {transform_indices = @transform_11, window_bounds = array<i64: 256, 32>}]} {
    %c0 = arith.constant 0 : index
    %c0_0 = arith.constant 0 : index
    %0 = vector.load %arg1[%c0, %c0_0] : memref<256x64xbf16, #tpu.memory_space<vmem>>, vector<256x64xbf16>
    %c0_1 = arith.constant 0 : index
    %c0_2 = arith.constant 0 : index
    %1 = vector.load %arg3[%c0_1, %c0_2] : memref<64x128xbf16, #tpu.memory_space<vmem>>, vector<64x128xbf16>
    %cst = arith.constant dense<0.000000e+00> : vector<256x128xf32>
    %2 = tpu.matmul %0, %1, %cst {dimension_numbers = #tpu.dot_dimension_numbers<[1], [0], [0], [1], [0, 0, 1, 1], [], []>} : vector<256x64xbf16>, vector<64x128xbf16>, vector<256x128xf32> -> vector<256x128xf32>
    %c0_3 = arith.constant 0 : index
    %c0_4 = arith.constant 0 : index
    %3 = vector.load %arg4[%c0_3, %c0_4] : memref<1x128xf32, #tpu.memory_space<vmem>>, vector<1x128xf32>
    %4 = vector.broadcast %3 : vector<1x128xf32> to vector<256x128xf32>
    %5 = arith.addf %2, %4 : vector<256x128xf32>
    %cst_5 = arith.constant 0.000000e+00 : f32
    %6 = vector.broadcast %cst_5 : f32 to vector<256x128xf32>
    %7 = arith.maximumf %5, %6 : vector<256x128xf32>
    %8 = arith.truncf %7 : vector<256x128xf32> to vector<256x128xbf16>
    %c0_6 = arith.constant 0 : index
    %c0_7 = arith.constant 0 : index
    %9 = vector.load %arg5[%c0_6, %c0_7] : memref<128x32xbf16, #tpu.memory_space<vmem>>, vector<128x32xbf16>
    %cst_8 = arith.constant dense<0.000000e+00> : vector<256x32xf32>
    %10 = tpu.matmul %8, %9, %cst_8 {dimension_numbers = #tpu.dot_dimension_numbers<[1], [0], [0], [1], [0, 0, 1, 1], [], []>} : vector<256x128xbf16>, vector<128x32xbf16>, vector<256x32xf32> -> vector<256x32xf32>
    %c0_9 = arith.constant 0 : index
    %c0_10 = arith.constant 0 : index
    %11 = vector.load %arg6[%c0_9, %c0_10] : memref<1x32xf32, #tpu.memory_space<vmem>>, vector<1x32xf32>
    %12 = vector.broadcast %11 : vector<1x32xf32> to vector<256x32xf32>
    %13 = arith.addf %10, %12 : vector<256x32xf32>
    %14 = vector.extract_strided_slice %13 {offsets = [0, 0], sizes = [256, 16], strides = [1, 1]} : vector<256x32xf32> to vector<256x16xf32>
    %15 = vector.extract_strided_slice %13 {offsets = [0, 16], sizes = [256, 16], strides = [1, 1]} : vector<256x32xf32> to vector<256x16xf32>
    %cst_11 = arith.constant 5.000000e-01 : f32
    %16 = vector.broadcast %cst_11 : f32 to vector<256x16xf32>
    %17 = arith.mulf %16, %15 : vector<256x16xf32>
    %18 = math.exp %17 : vector<256x16xf32>
    %c0_12 = arith.constant 0 : index
    %c0_13 = arith.constant 0 : index
    %19 = vector.load %arg2[%c0_12, %c0_13] : memref<256x16xf32, #tpu.memory_space<vmem>>, vector<256x16xf32>
    %20 = arith.mulf %19, %18 : vector<256x16xf32>
    %21 = arith.addf %14, %20 : vector<256x16xf32>
    %22 = arith.truncf %21 : vector<256x16xf32> to vector<256x16xbf16>
    %c0_14 = arith.constant 0 : index
    %c0_15 = arith.constant 0 : index
    %23 = vector.load %arg7[%c0_14, %c0_15] : memref<16x128xbf16, #tpu.memory_space<vmem>>, vector<16x128xbf16>
    %cst_16 = arith.constant dense<0.000000e+00> : vector<256x128xf32>
    %24 = tpu.matmul %22, %23, %cst_16 {dimension_numbers = #tpu.dot_dimension_numbers<[1], [0], [0], [1], [0, 0, 1, 1], [], []>} : vector<256x16xbf16>, vector<16x128xbf16>, vector<256x128xf32> -> vector<256x128xf32>
    %c0_17 = arith.constant 0 : index
    %c0_18 = arith.constant 0 : index
    %25 = vector.load %arg8[%c0_17, %c0_18] : memref<1x128xf32, #tpu.memory_space<vmem>>, vector<1x128xf32>
    %26 = vector.broadcast %25 : vector<1x128xf32> to vector<256x128xf32>
    %27 = arith.addf %24, %26 : vector<256x128xf32>
    %cst_19 = arith.constant 0.000000e+00 : f32
    %28 = vector.broadcast %cst_19 : f32 to vector<256x128xf32>
    %29 = arith.maximumf %27, %28 : vector<256x128xf32>
    %30 = arith.truncf %29 : vector<256x128xf32> to vector<256x128xbf16>
    %c0_20 = arith.constant 0 : index
    %c0_21 = arith.constant 0 : index
    %31 = vector.load %arg9[%c0_20, %c0_21] : memref<128x64xbf16, #tpu.memory_space<vmem>>, vector<128x64xbf16>
    %cst_22 = arith.constant dense<0.000000e+00> : vector<256x64xf32>
    %32 = tpu.matmul %30, %31, %cst_22 {dimension_numbers = #tpu.dot_dimension_numbers<[1], [0], [0], [1], [0, 0, 1, 1], [], []>} : vector<256x128xbf16>, vector<128x64xbf16>, vector<256x64xf32> -> vector<256x64xf32>
    %c0_23 = arith.constant 0 : index
    %c0_24 = arith.constant 0 : index
    %33 = vector.load %arg10[%c0_23, %c0_24] : memref<1x64xf32, #tpu.memory_space<vmem>>, vector<1x64xf32>
    %34 = vector.broadcast %33 : vector<1x64xf32> to vector<256x64xf32>
    %35 = arith.addf %32, %34 : vector<256x64xf32>
    %cst_25 = arith.constant 0.000000e+00 : f32
    %36 = vector.broadcast %cst_25 : f32 to vector<256x64xf32>
    %37 = arith.subf %36, %35 : vector<256x64xf32>
    %38 = math.exp %37 : vector<256x64xf32>
    %cst_26 = arith.constant 1.000000e+00 : f32
    %39 = vector.broadcast %cst_26 : f32 to vector<256x64xf32>
    %40 = arith.addf %39, %38 : vector<256x64xf32>
    %41 = tpu.reciprocal %40 {approx = true} : vector<256x64xf32> -> vector<256x64xf32>
    %c0_27 = arith.constant 0 : index
    %c0_28 = arith.constant 0 : index
    %42 = vector.load %arg11[%c0_27, %c0_28] : memref<256x64xf32, #tpu.memory_space<vmem>>, vector<256x64xf32>
    tpu.vector_store %arg11[%c0_27, %c0_28], %41 {strides = array<i32>} : memref<256x64xf32, #tpu.memory_space<vmem>>, vector<256x64xf32>,
    %c0_29 = arith.constant 0 : index
    %c0_30 = arith.constant 0 : index
    %43 = vector.load %arg12[%c0_29, %c0_30] : memref<256x32xf32, #tpu.memory_space<vmem>>, vector<256x32xf32>
    tpu.vector_store %arg12[%c0_29, %c0_30], %13 {strides = array<i32>} : memref<256x32xf32, #tpu.memory_space<vmem>>, vector<256x32xf32>,
    return
  }
  func.func @transform_0(%arg0: i32) -> (i32, i32) {
    %c0_i32 = arith.constant 0 : i32
    %c0_i32_0 = arith.constant 0 : i32
    return %arg0, %c0_i32 : i32, i32
  }
  func.func @transform_1(%arg0: i32) -> (i32, i32) {
    %c0_i32 = arith.constant 0 : i32
    %c0_i32_0 = arith.constant 0 : i32
    return %arg0, %c0_i32 : i32, i32
  }
  func.func @transform_2(%arg0: i32) -> (i32, i32) {
    %c0_i32 = arith.constant 0 : i32
    %c0_i32_0 = arith.constant 0 : i32
    %c0_i32_1 = arith.constant 0 : i32
    return %c0_i32, %c0_i32_0 : i32, i32
  }
  func.func @transform_3(%arg0: i32) -> (i32, i32) {
    %c0_i32 = arith.constant 0 : i32
    %c0_i32_0 = arith.constant 0 : i32
    %c0_i32_1 = arith.constant 0 : i32
    return %c0_i32, %c0_i32_0 : i32, i32
  }
  func.func @transform_4(%arg0: i32) -> (i32, i32) {
    %c0_i32 = arith.constant 0 : i32
    %c0_i32_0 = arith.constant 0 : i32
    %c0_i32_1 = arith.constant 0 : i32
    return %c0_i32, %c0_i32_0 : i32, i32
  }
  func.func @transform_5(%arg0: i32) -> (i32, i32) {
    %c0_i32 = arith.constant 0 : i32
    %c0_i32_0 = arith.constant 0 : i32
    %c0_i32_1 = arith.constant 0 : i32
    return %c0_i32, %c0_i32_0 : i32, i32
  }
  func.func @transform_6(%arg0: i32) -> (i32, i32) {
    %c0_i32 = arith.constant 0 : i32
    %c0_i32_0 = arith.constant 0 : i32
    %c0_i32_1 = arith.constant 0 : i32
    return %c0_i32, %c0_i32_0 : i32, i32
  }
  func.func @transform_7(%arg0: i32) -> (i32, i32) {
    %c0_i32 = arith.constant 0 : i32
    %c0_i32_0 = arith.constant 0 : i32
    %c0_i32_1 = arith.constant 0 : i32
    return %c0_i32, %c0_i32_0 : i32, i32
  }
  func.func @transform_8(%arg0: i32) -> (i32, i32) {
    %c0_i32 = arith.constant 0 : i32
    %c0_i32_0 = arith.constant 0 : i32
    %c0_i32_1 = arith.constant 0 : i32
    return %c0_i32, %c0_i32_0 : i32, i32
  }
  func.func @transform_9(%arg0: i32) -> (i32, i32) {
    %c0_i32 = arith.constant 0 : i32
    %c0_i32_0 = arith.constant 0 : i32
    %c0_i32_1 = arith.constant 0 : i32
    return %c0_i32, %c0_i32_0 : i32, i32
  }
  func.func @transform_10(%arg0: i32) -> (i32, i32) {
    %c0_i32 = arith.constant 0 : i32
    %c0_i32_0 = arith.constant 0 : i32
    return %arg0, %c0_i32 : i32, i32
  }
  func.func @transform_11(%arg0: i32) -> (i32, i32) {
    %c0_i32 = arith.constant 0 : i32
    %c0_i32_0 = arith.constant 0 : i32
    return %arg0, %c0_i32 : i32, i32
  }
}

</mosaic_0001>

<bundles_post_ra>
// kernel: tpu_custom_call.1
= control target key start
LH: loop header
LB: loop body
LE: loop exit
PB: predicated region body
PF: predicated region fallthrough
CT: control target
= control target key end

     0   :  { %s2902_s17 = smov 0   ;;  %s3553_s0 = inlined_call_operand.vmem [shape: bf16[512,64], index: 0, kind: input, shape index: {}]   ;;  %s3554_s1 = inlined_call_operand.vmem [shape: f32[512,16], index: 1, kind: input, shape index: {}]   ;;  %s3555_s2 = inlined_call_operand.vmem [shape: bf16[64,128], index: 2, kind: input, shape index: {}]   ;;  %s3556_s3 = inlined_call_operand.vmem [shape: f32[1,128], index: 3, kind: input, shape index: {}]   ;;  %s3557_s4 = inlined_call_operand.vmem [shape: bf16[128,32], index: 4, kind: input, shape index: {}]   ;;  %s3558_s5 = inlined_call_operand.vmem [shape: f32[1,32], index: 5, kind: input, shape index: {}]   ;;  %s3559_s6 = inlined_call_operand.vmem [shape: bf16[16,128], index: 6, kind: input, shape index: {}]   ;;  %s3560_s7 = inlined_call_operand.vmem [shape: f32[1,128], index: 7, kind: input, shape index: {}]   ;;  %s3561_s8 = inlined_call_operand.vmem [shape: bf16[128,64], index: 8, kind: input, shape index: {}]   ;;  %s3562_s9 = inlined_call_operand.vmem [shape: f32[1,64], index: 9, kind: input, shape index: {}]   ;;  %s3563_s10 = inlined_call_operand.vmem [shape: f32[512,64], index: 10, kind: output, shape index: {0}]   ;;  %s3564_s11 = inlined_call_operand.vmem [shape: f32[512,32], index: 11, kind: output, shape index: {1}]  }
   0x1 LB: > { %s2236_s18 = sadd.s32 4294967295, %s2839_s17   ;;  %p2240_p0 = scmp.ge.s32.totalorder %s2839_s17, 1  ;;  %s2839_s17 = sphi %s2902_s17, %s22_s17  }
   0x2   : > { %p352_p1 = scmp.lt.s32.totalorder %s2839_s17, 3 }
   0x4   : > { %p353_p2 = pnand %p2240_p0, %p352_p1 }
   0x5   : > { %v2604_v0 = vld [vmem:[%s3555_s2] sm:$0xff] (!%p353_p2)   ;;  %s2241_s21 = sshll.u32 (!%p353_p2), %s2236_s18, 5  ;;  %v2605_v1 = vld [vmem:[%s3555_s2 + $0x8] sm:$0xff] (!%p353_p2)   ;;  %v2606_v2 = vld [vmem:[%s3555_s2 + $0x10] sm:$0xff] (!%p353_p2)   ;;  %vm578_vm0 = vcmask (!%p353_p2), 523264   ;;  %vm2101_vm1 = vcmask (!%p353_p2), 261120  }
   0x6   : > { %356 = sbr.rel (%p353_p2) target bundleno = 1128 (0x468), region = 60  ;;  %p403_p3 = scmp.lt.s32.totalorder (!%p353_p2), %s2241_s21, 63  ;;  %2409 = vmatprep.subr.bf16.mxu0 (!%p353_p2), %v2604_v0  ;;  %v2624_v3 = vld [vmem:[%s3557_s4] sm:$0xff] (!%p353_p2)   ;;  %v2625_v4 = vld [vmem:[%s3557_s4 + $0x8] sm:$0xff] (!%p353_p2)   ;;  %v2607_v6 = vld [vmem:[%s3555_s2 + $0x18] sm:$0xff] (!%p353_p2)   ;;  %vm1419_vm2 = vcmask (!%p353_p2), 130048  }
   0x7   : > { %2410 = vmatpush3.bf16.msra.mxu0 (!%p353_p2), %v2604_v0  ;;  %2579 = vmatprep.subr.bf16.mxu1 (!%p353_p2), %v2624_v3  ;;  %v2626_v11 = vld [vmem:[%s3557_s4 + $0x10] sm:$0xff] (!%p353_p2)   ;;  %v2627_v12 = vld [vmem:[%s3557_s4 + $0x18] sm:$0xff] (!%p353_p2)   ;;  %v2628_v13 = vld [vmem:[%s3557_s4 + $0x20] sm:$0xff] (!%p353_p2)   ;;  %s2841_s23 = smov (!%p353_p2), 112  }
   0x8   : > { %2411 = vmatprep.subr.bf16.mxu0 (!%p353_p2), %v2605_v1  ;;  %2587 = vmatpush3.bf16.msra.mxu1 (!%p353_p2), %v2624_v3  ;;  %v2629_v16 = vld [vmem:[%s3557_s4 + $0x28] sm:$0xff] (!%p353_p2)   ;;  %v2630_v17 = vld [vmem:[%s3557_s4 + $0x30] sm:$0xff] (!%p353_p2)   ;;  %v2631_v27 = vld [vmem:[%s3557_s4 + $0x38] sm:$0xff] (!%p353_p2)  }
   0x9   : > { %2580 = vmatprep.subr.bf16.mxu1 (!%p353_p2), %v2625_v4  ;;  %v2989_v28 = vld [vmem:[%s3556_s3] ss:$0 sm:$0xff] (!%p353_p2) }
   0xb   : > { %2412 = vmatpush3.bf16.msra.mxu0 (!%p353_p2), %v2605_v1 }
   0xc   : > { %2413 = vmatprep.subr.bf16.mxu0 (!%p353_p2), %v2606_v2  ;;  %2588 = vmatpush3.bf16.msra.mxu1 (!%p353_p2), %v2625_v4 }
   0xd   : > { %s3566_s21 = smov (!%p403_p3, %s2241_s21), 63  ;;  %2581 = vmatprep.subr.bf16.mxu1 %v2626_v11 }
   0xe   : > { %s2242_s28 = sshll.u32 %s3566_s21, 2 }
   0xf   : > { %s2928_s12 = scalar_lea.vmem %s3553_s0, %s2242_s28  ;;  %2414 = vmatpush3.bf16.msra.mxu0 %v2606_v2 }
  0x10   : > { %v2608_v5 = vld [vmem:[%s2928_s12] sm:$0xff]   ;;  %2415 = vmatprep.subr.bf16.mxu0 %v2607_v6  ;;  %v2609_v7 = vld [vmem:[%s2928_s12 + $0x8] sm:$0xff]   ;;  %v2610_v8 = vld [vmem:[%s2928_s12 + $0x10] sm:$0xff]   ;;  %2589 = vmatpush3.bf16.msra.mxu1 %v2626_v11 }
  0x11   : > { %2417 = vmatprep.mubr.msk.bf16.mxu0 %vm578_vm0, %v2608_v5  ;;  %v2611_v9 = vld [vmem:[%s2928_s12 + $0x18] sm:$0xff]   ;;  %v2612_v10 = vld [vmem:[%s2928_s12 + $0x20] sm:$0xff]   ;;  %v2613_v14 = vld [vmem:[%s2928_s12 + $0x28] sm:$0xff]   ;;  %2582 = vmatprep.subr.bf16.mxu1 %v2627_v12 }
  0x12   : > { %v2614_v15 = vld [vmem:[%s2928_s12 + $0x30] sm:$0xff]   ;;  %v2615_v18 = vld [vmem:[%s2928_s12 + $0x38] sm:$0xff]   ;;  %v2616_v19 = vld [vmem:[%s2928_s12 + $0x40] sm:$0xff]  }
  0x13   : > { %2416 = vmatpush3.bf16.msra.mxu0 %v2607_v6  ;;  %v2617_v20 = vld [vmem:[%s2928_s12 + $0x48] sm:$0xff]   ;;  %v2618_v21 = vld [vmem:[%s2928_s12 + $0x50] sm:$0xff]   ;;  %v2619_v22 = vld [vmem:[%s2928_s12 + $0x58] sm:$0xff]  }
  0x14   : > { %2449 = vmatprep.subr.bf16.mxu0 %v2624_v3  ;;  %2590 = vmatpush3.bf16.msra.mxu1 %v2627_v12  ;;  %v2620_v23 = vld [vmem:[%s2928_s12 + $0x60] sm:$0xff]   ;;  %v2621_v24 = vld [vmem:[%s2928_s12 + $0x68] sm:$0xff]   ;;  %v2622_v25 = vld [vmem:[%s2928_s12 + $0x70] sm:$0xff]  }
  0x15   : > { %2583 = vmatprep.subr.bf16.mxu1 %v2628_v13  ;;  %v2623_v26 = vld [vmem:[%s2928_s12 + $0x78] sm:$0xff]   ;;  %s3024_s12 = sshll.u32 %s3566_s21, 3 }
  0x16   : > { %2418 = vmatmul.mubr.msk.bf16.vlgmr.msra.gmra.mrb[0].mxu0 %vm578_vm0, %v2609_v7  ;;  %s3035_s20 = scalar_lea.vmem %s3564_s11, %s3024_s12  ;;  %s3466_s14 = scalar_lea.vmem %s3563_s10, %s3024_s12 }
  0x17   : > { %2421 = vmatprep.mubr.msk.bf16.mxu0 %vm578_vm0, %v2610_v8  ;;  %2450 = vmatpush3.bf16.msra.mxu0 %v2624_v3 }
  0x18   : > { %2451 = vmatprep.subr.bf16.mxu0 %v2625_v4  ;;  %2591 = vmatpush3.bf16.msra.mxu1 %v2628_v13 }
  0x19   : > { %2584 = vmatprep.subr.bf16.mxu1 %v2629_v16 }
  0x1b   : > { %2452 = vmatpush3.bf16.msra.mxu0 %v2625_v4 }
  0x1c   : > { %2453 = vmatprep.subr.bf16.mxu0 %v2626_v11  ;;  %2592 = vmatpush3.bf16.msra.mxu1 %v2629_v16 }
  0x1d   : > { %2585 = vmatprep.subr.bf16.mxu1 %v2630_v17 }
  0x1e   : > { %2422 = vmatmul.mubr.msk.bf16.gmra.mrb[4].mxu0 %vm578_vm0, %v2611_v9 }
  0x1f   : > { %2425 = vmatprep.mubr.msk.bf16.mxu0 %vm578_vm0, %v2612_v10  ;;  %2454 = vmatpush3.bf16.msra.mxu0 %v2626_v11 }
  0x20   : > { %2455 = vmatprep.subr.bf16.mxu0 %v2627_v12  ;;  %2593 = vmatpush3.bf16.msra.mxu1 %v2630_v17 }
  0x21   : > { %2586 = vmatprep.subr.bf16.mxu1 %v2631_v27 }
  0x23   : > { %2456 = vmatpush3.bf16.msra.mxu0 %v2627_v12 }
  0x24   : > { %2457 = vmatprep.subr.bf16.mxu0 %v2628_v13  ;;  %2594 = vmatpush3.bf16.msra.mxu1 %v2631_v27 }
  0x26   : > { %2426 = vmatmul.mubr.msk.bf16.gmra.mrb[8].mxu0 %vm578_vm0, %v2613_v14 }
  0x27   : > { %2429 = vmatprep.mubr.msk.bf16.mxu0 %vm578_vm0, %v2614_v15  ;;  %2458 = vmatpush3.bf16.msra.mxu0 %v2628_v13 }
  0x28   : > { %2459 = vmatprep.subr.bf16.mxu0 %v2629_v16 }
  0x2b   : > { %2460 = vmatpush3.bf16.msra.mxu0 %v2629_v16 }
  0x2c   : > { %2461 = vmatprep.subr.bf16.mxu0 %v2630_v17 }
  0x2e   : > { %2430 = vmatmul.mubr.msk.bf16.gmra.mrb[12].mxu0 %vm578_vm0, %v2615_v18 }
  0x2f   : > { %2433 = vmatprep.mubr.msk.bf16.mxu0 %vm578_vm0, %v2616_v19  ;;  %2462 = vmatpush3.bf16.msra.mxu0 %v2630_v17 }
  0x30   : > { %2463 = vmatprep.subr.bf16.mxu0 %v2631_v27 }
  0x33   : > { %2464 = vmatpush3.bf16.msra.mxu0 %v2631_v27 }
  0x36   : > { %2434 = vmatmul.mubr.msk.bf16.gmra.mrb[16].mxu0 %vm578_vm0, %v2617_v20 }
  0x37   : > { %2437 = vmatprep.mubr.msk.bf16.mxu0 %vm578_vm0, %v2618_v21 }
  0x3e   : > { %2438 = vmatmul.mubr.msk.bf16.gmra.mrb[20].mxu0 %vm578_vm0, %v2619_v22 }
  0x3f   : > { %2441 = vmatprep.mubr.msk.bf16.mxu0 %vm578_vm0, %v2620_v23 }
  0x46   : > { %2442 = vmatmul.mubr.msk.bf16.gmra.mrb[24].mxu0 %vm578_vm0, %v2621_v24 }
  0x47   : > { %2445 = vmatprep.mubr.msk.bf16.mxu0 %vm578_vm0, %v2622_v25 }
  0x4e   : > { %2446 = vmatmul.mubr.msk.bf16.gmra.mrb[28].mxu0 %vm578_vm0, %v2623_v26 }
  0xe9   : > { %v2419_v29 = vpop.f32.mrb[0].mxu0 }
  0xea   : > { %v670_v30 = vadd.f32 %v2419_v29, %v2989_v28  ;;  %v661_v31 = vpop.f32.mrb[1].mxu0 }
  0xeb   : > { %v662_v32 = vadd.f32 %v2989_v28, %v661_v31  ;;  %v2420_v33 = vpop.f32.mrb[2].mxu0 }
  0xec   : > { %v673_v34 = vadd.f32 %v2420_v33, %v2989_v28  ;;  %v664_v35 = vpop.f32.mrb[3].mxu0  ;;  %v790_v37 = vmax.f32 %v670_v30, 0.0 }
  0xed   : > { %v665_v36 = vadd.f32 %v2989_v28, %v664_v35  ;;  %v788_v39 = vmax.f32 %v662_v32, 0.0 }
  0xee   : > { %v791_v38 = vmax.f32 %v673_v34, 0.0 }
  0xef   : > { %v789_v40 = vmax.f32 %v665_v36, 0.0 }
  0xf0   : > { %v821_v41 = vpack.c.bf16 %v791_v38, %v790_v37 }
  0xf1   : > { %v820_v42 = vpack.c.bf16 %v789_v40, %v788_v39  ;;  %v2423_v43 = vpop.f32.mrb[4].mxu0 }
  0xf2   : > { %v686_v44 = vadd.f32 %v2423_v43, %v2989_v28  ;;  %v677_v45 = vpop.f32.mrb[5].mxu0 }
  0xf3   : > { %v678_v46 = vadd.f32 %v2989_v28, %v677_v45  ;;  %v2424_v47 = vpop.f32.mrb[6].mxu0  ;;  %2465 = vmatprep.mubr.bf16.mxu0 %v820_v42 }
  0xf4   : > { %v689_v48 = vadd.f32 %v2424_v47, %v2989_v28  ;;  %v680_v49 = vpop.f32.mrb[7].mxu0  ;;  %2466 = vmatmul.mubr.bf16.vlgmr.msra.gmra.mrb[32].mxu0 %v821_v41  ;;  %v794_v51 = vmax.f32 %v686_v44, 0.0 }
  0xf5   : > { %v681_v50 = vadd.f32 %v2989_v28, %v680_v49  ;;  %v792_v53 = vmax.f32 %v678_v46, 0.0 }
  0xf6   : > { %v795_v52 = vmax.f32 %v689_v48, 0.0 }
  0xf7   : > { %v793_v54 = vmax.f32 %v681_v50, 0.0 }
  0xf8   : > { %v823_v55 = vpack.c.bf16 %v795_v52, %v794_v51 }
  0xf9   : > { %v2427_v56 = vpop.f32.mrb[8].mxu0  ;;  %v822_v57 = vpack.c.bf16 %v793_v54, %v792_v53 }
  0xfa   : > { %v702_v58 = vadd.f32 %v2427_v56, %v2989_v28  ;;  %v693_v59 = vpop.f32.mrb[9].mxu0 }
  0xfb   : > { %v694_v60 = vadd.f32 %v2989_v28, %v693_v59  ;;  %v2428_v61 = vpop.f32.mrb[10].mxu0  ;;  %2469 = vmatprep.mubr.bf16.mxu1 %v822_v57 }
  0xfc   : > { %v705_v62 = vadd.f32 %v2428_v61, %v2989_v28  ;;  %v696_v63 = vpop.f32.mrb[11].mxu0  ;;  %2470 = vmatmul.mubr.bf16.vlgmr.msra.gmra.mrb[0].mxu1 %v823_v55  ;;  %v798_v1 = vmax.f32 %v702_v58, 0.0 }
  0xfd   : > { %v697_v0 = vadd.f32 %v2989_v28, %v696_v63  ;;  %v796_v3 = vmax.f32 %v694_v60, 0.0 }
  0xfe   : > { %v799_v2 = vmax.f32 %v705_v62, 0.0 }
  0xff   : > { %v797_v4 = vmax.f32 %v697_v0, 0.0 }
 0x100   : > { %v825_v5 = vpack.c.bf16 %v799_v2, %v798_v1 }
 0x101   : > { %v824_v6 = vpack.c.bf16 %v797_v4, %v796_v3  ;;  %v2431_v7 = vpop.f32.mrb[12].mxu0 }
 0x102   : > { %v718_v8 = vadd.f32 %v2431_v7, %v2989_v28  ;;  %v709_v9 = vpop.f32.mrb[13].mxu0 }
 0x103   : > { %v710_v10 = vadd.f32 %v2989_v28, %v709_v9  ;;  %v2432_v11 = vpop.f32.mrb[14].mxu0  ;;  %2473 = vmatprep.mubr.bf16.mxu1 %v824_v6 }
 0x104   : > { %v721_v12 = vadd.f32 %v2432_v11, %v2989_v28  ;;  %v712_v13 = vpop.f32.mrb[15].mxu0  ;;  %2474 = vmatmul.mubr.bf16.gmra.mrb[4].mxu1 %v825_v5  ;;  %v802_v15 = vmax.f32 %v718_v8, 0.0 }
 0x105   : > { %v713_v14 = vadd.f32 %v2989_v28, %v712_v13  ;;  %v800_v17 = vmax.f32 %v710_v10, 0.0 }
 0x106   : > { %v803_v16 = vmax.f32 %v721_v12, 0.0 }
 0x107   : > { %v801_v18 = vmax.f32 %v713_v14, 0.0  ;;  %v3029_v14 = vld [vmem:[%s3558_s5] ss:$0 sm:$0xff] }
 0x108   : > { %v827_v19 = vpack.c.bf16 %v803_v16, %v802_v15 }
 0x109   : > { %v826_v20 = vpack.c.bf16 %v801_v18, %v800_v17  ;;  %v2435_v21 = vpop.f32.mrb[16].mxu0 }
 0x10a   : > { %v734_v22 = vadd.f32 %v2435_v21, %v2989_v28  ;;  %v725_v23 = vpop.f32.mrb[17].mxu0 }
 0x10b   : > { %v726_v24 = vadd.f32 %v2989_v28, %v725_v23  ;;  %v2436_v25 = vpop.f32.mrb[18].mxu0  ;;  %2477 = vmatprep.mubr.bf16.mxu1 %v826_v20 }
 0x10c   : > { %v737_v26 = vadd.f32 %v2436_v25, %v2989_v28  ;;  %v728_v27 = vpop.f32.mrb[19].mxu0  ;;  %2478 = vmatmul.mubr.bf16.gmra.mrb[8].mxu1 %v827_v19  ;;  %v806_v30 = vmax.f32 %v734_v22, 0.0 }
 0x10d   : > { %v729_v29 = vadd.f32 %v2989_v28, %v728_v27  ;;  %v804_v32 = vmax.f32 %v726_v24, 0.0 }
 0x10e   : > { %v807_v31 = vmax.f32 %v737_v26, 0.0 }
 0x10f   : > { %v805_v33 = vmax.f32 %v729_v29, 0.0 }
 0x110   : > { %v829_v34 = vpack.c.bf16 %v807_v31, %v806_v30 }
 0x111   : > { %v828_v35 = vpack.c.bf16 %v805_v33, %v804_v32  ;;  %v2439_v36 = vpop.f32.mrb[20].mxu0 }
 0x112   : > { %v750_v37 = vadd.f32 %v2439_v36, %v2989_v28  ;;  %v741_v38 = vpop.f32.mrb[21].mxu0 }
 0x113   : > { %v742_v39 = vadd.f32 %v2989_v28, %v741_v38  ;;  %v2440_v40 = vpop.f32.mrb[22].mxu0  ;;  %2481 = vmatprep.mubr.bf16.mxu1 %v828_v35  ;;  %v2632_v38 = vld [vmem:[%s3559_s6] sm:$0xff]  }
 0x114   : > { %v753_v41 = vadd.f32 %v2440_v40, %v2989_v28  ;;  %v744_v42 = vpop.f32.mrb[23].mxu0  ;;  %2482 = vmatmul.mubr.bf16.gmra.mrb[12].mxu1 %v829_v34  ;;  %v810_v44 = vmax.f32 %v750_v37, 0.0  ;;  %2497 = vmatprep.subr.bf16.mxu0 %v2632_v38 }
 0x115   : > { %v745_v43 = vadd.f32 %v2989_v28, %v744_v42  ;;  %v808_v46 = vmax.f32 %v742_v39, 0.0  ;;  %2498 = vmatpush3.bf16.msra.mxu0 %v2632_v38 }
 0x116   : > { %v811_v45 = vmax.f32 %v753_v41, 0.0 }
 0x117   : > { %v809_v47 = vmax.f32 %v745_v43, 0.0 }
 0x118   : > { %v831_v48 = vpack.c.bf16 %v811_v45, %v810_v44 }
 0x119   : > { %v830_v49 = vpack.c.bf16 %v809_v47, %v808_v46  ;;  %v2443_v50 = vpop.f32.mrb[24].mxu0 }
 0x11a   : > { %v766_v51 = vadd.f32 %v2443_v50, %v2989_v28  ;;  %v757_v52 = vpop.f32.mrb[25].mxu0 }
 0x11b   : > { %v758_v53 = vadd.f32 %v2989_v28, %v757_v52  ;;  %v2444_v54 = vpop.f32.mrb[26].mxu0  ;;  %2485 = vmatprep.mubr.bf16.mxu1 %v830_v49 }
 0x11c   : > { %v769_v55 = vadd.f32 %v2444_v54, %v2989_v28  ;;  %v760_v56 = vpop.f32.mrb[27].mxu0  ;;  %2486 = vmatmul.mubr.bf16.gmra.mrb[16].mxu1 %v831_v48  ;;  %v814_v58 = vmax.f32 %v766_v51, 0.0 }
 0x11d   : > { %v761_v57 = vadd.f32 %v2989_v28, %v760_v56  ;;  %v812_v60 = vmax.f32 %v758_v53, 0.0 }
 0x11e   : > { %v815_v59 = vmax.f32 %v769_v55, 0.0 }
 0x11f   : > { %v813_v61 = vmax.f32 %v761_v57, 0.0 }
 0x120   : > { %v833_v62 = vpack.c.bf16 %v815_v59, %v814_v58 }
 0x121   : > { %v832_v63 = vpack.c.bf16 %v813_v61, %v812_v60  ;;  %v2447_v0 = vpop.f32.mrb[28].mxu0 }
 0x122   : > { %v782_v1 = vadd.f32 %v2447_v0, %v2989_v28  ;;  %v773_v2 = vpop.f32.mrb[29].mxu0 }
 0x123   : > { %v774_v3 = vadd.f32 %v2989_v28, %v773_v2  ;;  %v2448_v4 = vpop.f32.mrb[30].mxu0  ;;  %2489 = vmatprep.mubr.bf16.mxu1 %v832_v63 }
 0x124   : > { %v785_v5 = vadd.f32 %v2448_v4, %v2989_v28  ;;  %v776_v6 = vpop.f32.mrb[31].mxu0  ;;  %2490 = vmatmul.mubr.bf16.gmra.mrb[20].mxu1 %v833_v62  ;;  %v818_v8 = vmax.f32 %v782_v1, 0.0 }
 0x125   : > { %v777_v7 = vadd.f32 %v2989_v28, %v776_v6  ;;  %v816_v10 = vmax.f32 %v774_v3, 0.0 }
 0x126   : > { %v819_v9 = vmax.f32 %v785_v5, 0.0 }
 0x127   : > { %v817_v11 = vmax.f32 %v777_v7, 0.0 }
 0x128   : > { %v835_v12 = vpack.c.bf16 %v819_v9, %v818_v8 }
 0x129   : > { %v834_v13 = vpack.c.bf16 %v817_v11, %v816_v10 }
 0x12b   : > { %2493 = vmatprep.mubr.bf16.mxu1 %v834_v13 }
 0x12c   : > { %2494 = vmatmul.mubr.bf16.gmra.mrb[24].mxu1 %v835_v12 }
 0x1c7   : > { %v2467_v28 = vpop.f32.mrb[32].mxu0 }
 0x1c8   : > { %v3038_v15 = vadd.f32 %v2467_v28, %v3029_v14  ;;  %v941_v16 = vpop.f32.mrb[33].mxu0 }
 0x1c9   : > { %v3041_v17 = vadd.f32 %v3029_v14, %v941_v16  ;;  %v2468_v18 = vpop.f32.mrb[34].mxu0 }
 0x1ca   : > { %v1070_v19 = vmul.f32 0.5, %v3038_v15  ;;  %2104 = vst.msk [vmem:[%s3035_s20 + $0x10] sm:$0xff] %vm2101_vm1, %v3038_v15  ;;  %v3048_v20 = vadd.f32 %v2468_v18, %v3029_v14  ;;  %v944_v21 = vpop.f32.mrb[35].mxu0 }
 0x1cb   : > { %v1068_v22 = vmul.f32 0.5, %v3041_v17  ;;  %2102 = vst.msk [vmem:[%s3035_s20] sm:$0xff] %vm2101_vm1, %v3041_v17  ;;  %v3055_v23 = vadd.f32 %v3029_v14, %v944_v21 }
 0x1cc   : > { %v1104_v24 = vmul.f32 1.442695, %v1070_v19  ;;  %v1071_v25 = vmul.f32 0.5, %v3048_v20  ;;  %2105 = vst.msk [vmem:[%s3035_s20 + $0x18] sm:$0xff] %vm2101_vm1, %v3048_v20 }
 0x1cd   : > { %v1100_v26 = vmul.f32 1.442695, %v1068_v22  ;;  %v1069_v27 = vmul.f32 0.5, %v3055_v23  ;;  %2103 = vst.msk [vmem:[%s3035_s20 + $0x8] sm:$0xff] %vm2101_vm1, %v3055_v23 }
 0x1ce   : > { %2641 = vpow2.f32 %v1104_v24  ;;  %v1106_v29 = vmul.f32 1.442695, %v1071_v25 }
 0x1cf   : > { %2643 = vpow2.f32 %v1100_v26  ;;  %v1102_v30 = vmul.f32 1.442695, %v1069_v27  ;;  %v2471_v31 = vpop.f32.mrb[0].mxu1 }
 0x1d0   : > { %v3066_v32 = vadd.f32 %v2471_v31, %v3029_v14  ;;  %v957_v33 = vpop.f32.mrb[1].mxu1  ;;  %2645 = vpow2.f32 %v1106_v29 }
 0x1d1   : > { %v3069_v34 = vadd.f32 %v3029_v14, %v957_v33  ;;  %v2472_v35 = vpop.f32.mrb[2].mxu1  ;;  %2647 = vpow2.f32 %v1102_v30 }
 0x1d2   : > { %2108 = vst.msk [vmem:[%s3035_s20 + $0x30] sm:$0xff] %vm2101_vm1, %v3066_v32  ;;  %v3075_v36 = vadd.f32 %v2472_v35, %v3029_v14  ;;  %v960_v37 = vpop.f32.mrb[3].mxu1  ;;  %v1074_v39 = vmul.f32 0.5, %v3066_v32 }
 0x1d3   : > { %v1072_v40 = vmul.f32 0.5, %v3069_v34  ;;  %2106 = vst.msk [vmem:[%s3035_s20 + $0x20] sm:$0xff] %vm2101_vm1, %v3069_v34  ;;  %v3086_v41 = vadd.f32 %v3029_v14, %v960_v37 }
 0x1d4   : > { %2109 = vst.msk [vmem:[%s3035_s20 + $0x38] sm:$0xff] %vm2101_vm1, %v3075_v36  ;;  %v1075_v43 = vmul.f32 0.5, %v3075_v36  ;;  %v1112_v45 = vmul.f32 1.442695, %v1074_v39 }
 0x1d5   : > { %v1108_v42 = vmul.f32 1.442695, %v1072_v40  ;;  %v1073_v44 = vmul.f32 0.5, %v3086_v41  ;;  %2107 = vst.msk [vmem:[%s3035_s20 + $0x28] sm:$0xff] %vm2101_vm1, %v3086_v41 }
 0x1d6   : > { %v1114_v52 = vmul.f32 1.442695, %v1075_v43 }
 0x1d7   : > { %2649 = vpow2.f32 %v1108_v42  ;;  %v1110_v46 = vmul.f32 1.442695, %v1073_v44  ;;  %v2475_v47 = vpop.f32.mrb[4].mxu1 }
 0x1d8   : > { %v2642_v48 = vpop.eup %2641  ;;  %v3097_v49 = vadd.f32 %v2475_v47, %v3029_v14  ;;  %v973_v50 = vpop.f32.mrb[5].mxu1 }
 0x1d9   : > { %v2644_v51 = vpop.eup %2643  ;;  %2651 = vpow2.f32 %v1110_v46  ;;  %v3100_v53 = vadd.f32 %v3029_v14, %v973_v50  ;;  %v2476_v54 = vpop.f32.mrb[6].mxu1  ;;  %1232 = vrot.lane.b32.xlu1 %v2642_v48, %s2841_s23 }
 0x1da   : > { %2112 = vst.msk [vmem:[%s3035_s20 + $0x50] sm:$0xff] %vm2101_vm1, %v3097_v49  ;;  %v3107_v55 = vadd.f32 %v2476_v54, %v3029_v14  ;;  %v976_v56 = vpop.f32.mrb[7].mxu1  ;;  %1228 = vrot.lane.b32.xlu0 %v2644_v51, %s2841_s23  ;;  %2653 = vpow2.f32 %v1112_v45  ;;  %v1078_v57 = vmul.f32 0.5, %v3097_v49  ;;  %v2646_v60 = vpop.eup %2645 }
 0x1db   : > { %v1076_v58 = vmul.f32 0.5, %v3100_v53  ;;  %2110 = vst.msk [vmem:[%s3035_s20 + $0x40] sm:$0xff] %vm2101_vm1, %v3100_v53  ;;  %v3116_v59 = vadd.f32 %v3029_v14, %v976_v56  ;;  %v2648_v61 = vpop.eup %2647  ;;  %2655 = vpow2.f32 %v1114_v52 }
 0x1dc   : > { %2113 = vst.msk [vmem:[%s3035_s20 + $0x58] sm:$0xff] %vm2101_vm1, %v3107_v55  ;;  %v1079_v63 = vmul.f32 0.5, %v3107_v55  ;;  %v1120_v1 = vmul.f32 1.442695, %v1078_v57 }
 0x1dd   : > { %v1116_v62 = vmul.f32 1.442695, %v1076_v58  ;;  %v1077_v0 = vmul.f32 0.5, %v3116_v59  ;;  %2111 = vst.msk [vmem:[%s3035_s20 + $0x48] sm:$0xff] %vm2101_vm1, %v3116_v59  ;;  %1234 = vrot.lane.b32.xlu1 %v2646_v60, %s2841_s23 }
 0x1de   : > { %1230 = vrot.lane.b32.xlu0 %v2648_v61, %s2841_s23  ;;  %v1122_v7 = vmul.f32 1.442695, %v1079_v63 }
 0x1df   : > { %2657 = vpow2.f32 %v1116_v62  ;;  %v1118_v2 = vmul.f32 1.442695, %v1077_v0  ;;  %v2479_v3 = vpop.f32.mrb[8].mxu1 }
 0x1e0   : > { %v3129_v4 = vadd.f32 %v2479_v3, %v3029_v14  ;;  %v989_v5 = vpop.f32.mrb[9].mxu1 }
 0x1e1   : > { %v2650_v6 = vpop.eup %2649  ;;  %2659 = vpow2.f32 %v1118_v2  ;;  %v3132_v8 = vadd.f32 %v3029_v14, %v989_v5  ;;  %v2480_v9 = vpop.f32.mrb[10].mxu1 }
 0x1e2   : > { %2116 = vst.msk [vmem:[%s3035_s20 + $0x70] sm:$0xff] %vm2101_vm1, %v3129_v4  ;;  %v3138_v10 = vadd.f32 %v2480_v9, %v3029_v14  ;;  %v992_v11 = vpop.f32.mrb[11].mxu1  ;;  %1236 = vrot.lane.b32.xlu0 %v2650_v6, %s2841_s23  ;;  %2661 = vpow2.f32 %v1120_v1  ;;  %v1082_v13 = vmul.f32 0.5, %v3129_v4 }
 0x1e3   : > { %v2652_v12 = vpop.eup %2651  ;;  %v1080_v28 = vmul.f32 0.5, %v3132_v8  ;;  %2114 = vst.msk [vmem:[%s3035_s20 + $0x60] sm:$0xff] %vm2101_vm1, %v3132_v8  ;;  %v3147_v16 = vadd.f32 %v3029_v14, %v992_v11  ;;  %2663 = vpow2.f32 %v1122_v7 }
 0x1e4   : > { %2117 = vst.msk [vmem:[%s3035_s20 + $0x78] sm:$0xff] %vm2101_vm1, %v3138_v10  ;;  %1238 = vrot.lane.b32.xlu1 %v2652_v12, %s2841_s23  ;;  %v2654_v18 = vpop.eup %2653  ;;  %v1083_v21 = vmul.f32 0.5, %v3138_v10  ;;  %v1128_v25 = vmul.f32 1.442695, %v1082_v13 }
 0x1e5   : > { %v1124_v19 = vmul.f32 1.442695, %v1080_v28  ;;  %v1081_v22 = vmul.f32 0.5, %v3147_v16  ;;  %2115 = vst.msk [vmem:[%s3035_s20 + $0x68] sm:$0xff] %vm2101_vm1, %v3147_v16  ;;  %v2656_v24 = vpop.eup %2655 }
 0x1e6   : > { %1240 = vrot.lane.b32.xlu0 %v2654_v18, %s2841_s23  ;;  %v1130_v33 = vmul.f32 1.442695, %v1083_v21 }
 0x1e7   : > { %2665 = vpow2.f32 %v1124_v19  ;;  %v1126_v26 = vmul.f32 1.442695, %v1081_v22  ;;  %v2483_v27 = vpop.f32.mrb[12].mxu1 }
 0x1e8   : > { %v3160_v29 = vadd.f32 %v2483_v27, %v3029_v14  ;;  %v1005_v30 = vpop.f32.mrb[13].mxu1  ;;  %1242 = vrot.lane.b32.xlu1 %v2656_v24, %s2841_s23 }
 0x1e9   : > { %v2658_v31 = vpop.eup %2657  ;;  %2667 = vpow2.f32 %v1126_v26  ;;  %v3164_v35 = vadd.f32 %v3029_v14, %v1005_v30  ;;  %v2484_v37 = vpop.f32.mrb[14].mxu1 }
 0x1ea   : > { %2120 = vst.msk [vmem:[%s3035_s20 + $0x90] sm:$0xff] %vm2101_vm1, %v3160_v29  ;;  %v3170_v38 = vadd.f32 %v2484_v37, %v3029_v14  ;;  %v1008_v39 = vpop.f32.mrb[15].mxu1  ;;  %1244 = vrot.lane.b32.xlu0 %v2658_v31, %s2841_s23  ;;  %2669 = vpow2.f32 %v1128_v25  ;;  %v1086_v42 = vmul.f32 0.5, %v3160_v29 }
 0x1eb   : > { %v2660_v40 = vpop.eup %2659  ;;  %v1084_v43 = vmul.f32 0.5, %v3164_v35  ;;  %2118 = vst.msk [vmem:[%s3035_s20 + $0x80] sm:$0xff] %vm2101_vm1, %v3164_v35  ;;  %v3179_v44 = vadd.f32 %v3029_v14, %v1008_v39  ;;  %2671 = vpow2.f32 %v1130_v33 }
 0x1ec   : > { %2121 = vst.msk [vmem:[%s3035_s20 + $0x98] sm:$0xff] %vm2101_vm1, %v3170_v38  ;;  %1246 = vrot.lane.b32.xlu1 %v2660_v40, %s2841_s23  ;;  %v2662_v45 = vpop.eup %2661  ;;  %v1087_v47 = vmul.f32 0.5, %v3170_v38  ;;  %v1136_v51 = vmul.f32 1.442695, %v1086_v42 }
 0x1ed   : > { %v1132_v46 = vmul.f32 1.442695, %v1084_v43  ;;  %v1085_v48 = vmul.f32 0.5, %v3179_v44  ;;  %2119 = vst.msk [vmem:[%s3035_s20 + $0x88] sm:$0xff] %vm2101_vm1, %v3179_v44  ;;  %v2664_v50 = vpop.eup %2663 }
 0x1ee   : > { %1248 = vrot.lane.b32.xlu0 %v2662_v45, %s2841_s23  ;;  %v1138_v60 = vmul.f32 1.442695, %v1087_v47 }
 0x1ef   : > { %2673 = vpow2.f32 %v1132_v46  ;;  %v1134_v52 = vmul.f32 1.442695, %v1085_v48  ;;  %v2487_v54 = vpop.f32.mrb[16].mxu1 }
 0x1f0   : > { %v3192_v56 = vadd.f32 %v2487_v54, %v3029_v14  ;;  %v1021_v57 = vpop.f32.mrb[17].mxu1  ;;  %1250 = vrot.lane.b32.xlu1 %v2664_v50, %s2841_s23 }
 0x1f1   : > { %v2666_v58 = vpop.eup %2665  ;;  %2675 = vpow2.f32 %v1134_v52  ;;  %v3196_v61 = vadd.f32 %v3029_v14, %v1021_v57  ;;  %v2488_v62 = vpop.f32.mrb[18].mxu1 }
 0x1f2   : > { %2124 = vst.msk [vmem:[%s3035_s20 + $0xb0] sm:$0xff] %vm2101_vm1, %v3192_v56  ;;  %v3202_v63 = vadd.f32 %v2488_v62, %v3029_v14  ;;  %v1024_v0 = vpop.f32.mrb[19].mxu1  ;;  %1252 = vrot.lane.b32.xlu0 %v2666_v58, %s2841_s23  ;;  %2677 = vpow2.f32 %v1136_v51  ;;  %v1090_v2 = vmul.f32 0.5, %v3192_v56 }
 0x1f3   : > { %v2668_v1 = vpop.eup %2667  ;;  %v1088_v3 = vmul.f32 0.5, %v3196_v61  ;;  %2122 = vst.msk [vmem:[%s3035_s20 + $0xa0] sm:$0xff] %vm2101_vm1, %v3196_v61  ;;  %v3211_v5 = vadd.f32 %v3029_v14, %v1024_v0  ;;  %2679 = vpow2.f32 %v1138_v60 }
 0x1f4   : > { %2125 = vst.msk [vmem:[%s3035_s20 + $0xb8] sm:$0xff] %vm2101_vm1, %v3202_v63  ;;  %1254 = vrot.lane.b32.xlu1 %v2668_v1, %s2841_s23  ;;  %v2670_v6 = vpop.eup %2669  ;;  %v1091_v9 = vmul.f32 0.5, %v3202_v63  ;;  %v1144_v13 = vmul.f32 1.442695, %v1090_v2 }
 0x1f5   : > { %v1140_v7 = vmul.f32 1.442695, %v1088_v3  ;;  %v1089_v11 = vmul.f32 0.5, %v3211_v5  ;;  %2123 = vst.msk [vmem:[%s3035_s20 + $0xa8] sm:$0xff] %vm2101_vm1, %v3211_v5  ;;  %v2672_v12 = vpop.eup %2671 }
 0x1f6   : > { %1256 = vrot.lane.b32.xlu0 %v2670_v6, %s2841_s23  ;;  %v1146_v24 = vmul.f32 1.442695, %v1091_v9 }
 0x1f7   : > { %2681 = vpow2.f32 %v1140_v7  ;;  %v1142_v28 = vmul.f32 1.442695, %v1089_v11  ;;  %v2491_v18 = vpop.f32.mrb[20].mxu1 }
 0x1f8   : > { %v3224_v19 = vadd.f32 %v2491_v18, %v3029_v14  ;;  %v1037_v21 = vpop.f32.mrb[21].mxu1  ;;  %1258 = vrot.lane.b32.xlu1 %v2672_v12, %s2841_s23 }
 0x1f9   : > { %v2674_v22 = vpop.eup %2673  ;;  %2683 = vpow2.f32 %v1142_v28  ;;  %v3228_v25 = vadd.f32 %v3029_v14, %v1037_v21  ;;  %v2492_v26 = vpop.f32.mrb[22].mxu1 }
 0x1fa   : > { %2128 = vst.msk [vmem:[%s3035_s20 + $0xd0] sm:$0xff] %vm2101_vm1, %v3224_v19  ;;  %v3234_v27 = vadd.f32 %v2492_v26, %v3029_v14  ;;  %v1040_v30 = vpop.f32.mrb[23].mxu1  ;;  %1260 = vrot.lane.b32.xlu0 %v2674_v22, %s2841_s23  ;;  %2685 = vpow2.f32 %v1144_v13  ;;  %v1094_v33 = vmul.f32 0.5, %v3224_v19 }
 0x1fb   : > { %v2676_v31 = vpop.eup %2675  ;;  %v1092_v37 = vmul.f32 0.5, %v3228_v25  ;;  %2126 = vst.msk [vmem:[%s3035_s20 + $0xc0] sm:$0xff] %vm2101_vm1, %v3228_v25  ;;  %v3243_v39 = vadd.f32 %v3029_v14, %v1040_v30  ;;  %2687 = vpow2.f32 %v1146_v24 }
 0x1fc   : > { %2129 = vst.msk [vmem:[%s3035_s20 + $0xd8] sm:$0xff] %vm2101_vm1, %v3234_v27  ;;  %1262 = vrot.lane.b32.xlu1 %v2676_v31, %s2841_s23  ;;  %v2678_v40 = vpop.eup %2677  ;;  %v1095_v43 = vmul.f32 0.5, %v3234_v27  ;;  %v1152_v47 = vmul.f32 1.442695, %v1094_v33  ;;  %v2633_v31 = vld [vmem:[%s3561_s8] sm:$0xff]   ;;  %v2634_v33 = vld [vmem:[%s3561_s8 + $0x8] sm:$0xff]  }
 0x1fd   : > { %v1148_v42 = vmul.f32 1.442695, %v1092_v37  ;;  %v1093_v45 = vmul.f32 0.5, %v3243_v39  ;;  %2127 = vst.msk [vmem:[%s3035_s20 + $0xc8] sm:$0xff] %vm2101_vm1, %v3243_v39  ;;  %v2680_v46 = vpop.eup %2679  ;;  %2531 = vmatprep.subr.bf16.mxu1 %v2633_v31 }
 0x1fe   : > { %1264 = vrot.lane.b32.xlu0 %v2678_v40, %s2841_s23  ;;  %v1154_v57 = vmul.f32 1.442695, %v1095_v43  ;;  %2532 = vmatpush3.bf16.msra.mxu1 %v2633_v31 }
 0x1ff   : > { %2689 = vpow2.f32 %v1148_v42  ;;  %v1150_v48 = vmul.f32 1.442695, %v1093_v45  ;;  %v2495_v50 = vpop.f32.mrb[24].mxu1  ;;  %2533 = vmatprep.subr.bf16.mxu1 %v2634_v33  ;;  %v2635_v42 = vld [vmem:[%s3561_s8 + $0x10] sm:$0xff]   ;;  %v2636_v45 = vld [vmem:[%s3561_s8 + $0x18] sm:$0xff]  }
 0x200   : > { %v3256_v51 = vadd.f32 %v2495_v50, %v3029_v14  ;;  %v1053_v52 = vpop.f32.mrb[25].mxu1  ;;  %1266 = vrot.lane.b32.xlu1 %v2680_v46, %s2841_s23  ;;  %v2637_v46 = vld [vmem:[%s3561_s8 + $0x20] sm:$0xff]  }
 0x201   : > { %v2682_v54 = vpop.eup %2681  ;;  %2691 = vpow2.f32 %v1150_v48  ;;  %v3260_v58 = vadd.f32 %v3029_v14, %v1053_v52  ;;  %v2496_v60 = vpop.f32.mrb[26].mxu1  ;;  %v2639_v48 = vld [vmem:[%s3561_s8 + $0x30] sm:$0xff]  }
 0x202   : > { %2132 = vst.msk [vmem:[%s3035_s20 + $0xf0] sm:$0xff] %vm2101_vm1, %v3256_v51  ;;  %v3266_v62 = vadd.f32 %v2496_v60, %v3029_v14  ;;  %v1056_v0 = vpop.f32.mrb[27].mxu1  ;;  %1268 = vrot.lane.b32.xlu0 %v2682_v54, %s2841_s23  ;;  %2693 = vpow2.f32 %v1152_v47  ;;  %v1098_v2 = vmul.f32 0.5, %v3256_v51  ;;  %2534 = vmatpush3.bf16.msra.mxu1 %v2634_v33  ;;  %v2638_v47 = vld [vmem:[%s3561_s8 + $0x28] sm:$0xff]  }
 0x203   : > { %v2684_v1 = vpop.eup %2683  ;;  %v1096_v3 = vmul.f32 0.5, %v3260_v58  ;;  %2130 = vst.msk [vmem:[%s3035_s20 + $0xe0] sm:$0xff] %vm2101_vm1, %v3260_v58  ;;  %v3275_v6 = vadd.f32 %v3029_v14, %v1056_v0  ;;  %2695 = vpow2.f32 %v1154_v57  ;;  %2535 = vmatprep.subr.bf16.mxu1 %v2635_v42 }
 0x204   : > { %2133 = vst.msk [vmem:[%s3035_s20 + $0xf8] sm:$0xff] %vm2101_vm1, %v3266_v62  ;;  %1270 = vrot.lane.b32.xlu1 %v2684_v1, %s2841_s23  ;;  %v2686_v7 = vpop.eup %2685  ;;  %v1099_v11 = vmul.f32 0.5, %v3266_v62  ;;  %v1160_v14 = vmul.f32 1.442695, %v1098_v2 }
 0x205   : > { %v1156_v9 = vmul.f32 1.442695, %v1096_v3  ;;  %v1097_v12 = vmul.f32 0.5, %v3275_v6  ;;  %2131 = vst.msk [vmem:[%s3035_s20 + $0xe8] sm:$0xff] %vm2101_vm1, %v3275_v6  ;;  %v2688_v13 = vpop.eup %2687 }
 0x206   : > { %1272 = vrot.lane.b32.xlu0 %v2686_v7, %s2841_s23  ;;  %v1162_v21 = vmul.f32 1.442695, %v1099_v11  ;;  %2536 = vmatpush3.bf16.msra.mxu1 %v2635_v42 }
 0x207   : > { %2697 = vpow2.f32 %v1156_v9  ;;  %v1158_v28 = vmul.f32 1.442695, %v1097_v12  ;;  %2537 = vmatprep.subr.bf16.mxu1 %v2636_v45 }
 0x208   : > { %1274 = vrot.lane.b32.xlu1 %v2688_v13, %s2841_s23 }
 0x209   : > { %v2690_v18 = vpop.eup %2689  ;;  %2699 = vpow2.f32 %v1158_v28 }
 0x20a   : > { %1276 = vrot.lane.b32.xlu0 %v2690_v18, %s2841_s23  ;;  %2701 = vpow2.f32 %v1160_v14  ;;  %2538 = vmatpush3.bf16.msra.mxu1 %v2636_v45 }
 0x20b   : > { %v2692_v22 = vpop.eup %2691  ;;  %2703 = vpow2.f32 %v1162_v21  ;;  %2539 = vmatprep.subr.bf16.mxu1 %v2637_v46 }
 0x20c   : > { %1278 = vrot.lane.b32.xlu1 %v2692_v22, %s2841_s23  ;;  %v2694_v24 = vpop.eup %2693 }
 0x20d   : > { %v2696_v26 = vpop.eup %2695 }
 0x20e   : > { %1280 = vrot.lane.b32.xlu0 %v2694_v24, %s2841_s23  ;;  %2540 = vmatpush3.bf16.msra.mxu1 %v2637_v46 }
 0x20f   : > { %2541 = vmatprep.subr.bf16.mxu1 %v2638_v47 }
 0x210   : > { %1282 = vrot.lane.b32.xlu1 %v2696_v26, %s2841_s23 }
 0x211   : > { %v2698_v30 = vpop.eup %2697 }
 0x212   : > { %1284 = vrot.lane.b32.xlu0 %v2698_v30, %s2841_s23  ;;  %2542 = vmatpush3.bf16.msra.mxu1 %v2638_v47 }
 0x213   : > { %v2700_v37 = vpop.eup %2699  ;;  %2543 = vmatprep.subr.bf16.mxu1 %v2639_v48 }
 0x214   : > { %1286 = vrot.lane.b32.xlu1 %v2700_v37, %s2841_s23  ;;  %v2702_v40 = vpop.eup %2701 }
 0x215   : > { %v2704_v43 = vpop.eup %2703 }
 0x216   : > { %1288 = vrot.lane.b32.xlu0 %v2702_v40, %s2841_s23  ;;  %2544 = vmatpush3.bf16.msra.mxu1 %v2639_v48 }
 0x218   : > { %1290 = vrot.lane.b32.xlu1 %v2704_v43, %s2841_s23  ;;  %s3321_s23 = scalar_lea.vmem %s3554_s1, %s3024_s12 }
 0x219   : > { %v1164_v52 = vld [vmem:[%s3321_s23] sm:$0xff]  ;;  %v1166_v57 = vld [vmem:[%s3321_s23 + $0x10] sm:$0xff]  ;;  %v1167_v60 = vld [vmem:[%s3321_s23 + $0x18] sm:$0xff] }
 0x21a   : > { %v1165_v0 = vld [vmem:[%s3321_s23 + $0x8] sm:$0xff]  ;;  %v1168_v13 = vld [vmem:[%s3321_s23 + $0x20] sm:$0xff]  ;;  %v1170_v33 = vld [vmem:[%s3321_s23 + $0x30] sm:$0xff] }
 0x21b   : > { %v1169_v22 = vld [vmem:[%s3321_s23 + $0x28] sm:$0xff]  ;;  %v1172_v43 = vld [vmem:[%s3321_s23 + $0x40] sm:$0xff] }
 0x21c   : > { %v1173_v48 = vld [vmem:[%s3321_s23 + $0x48] sm:$0xff] }
 0x24b   : > { %v1233_v50 = vpop.permute.xlu1 %1232 }
 0x24c   : > { %v1229_v54 = vpop.permute.xlu0 %1228  ;;  %v1326_v3 = vmul.f32 %v1233_v50, %v1166_v57  ;;  %v1174_v57 = vld [vmem:[%s3321_s23 + $0x50] sm:$0xff] }
 0x24d   : > { %v1324_v1 = vmul.f32 %v1229_v54, %v1164_v52 }
 0x24e   : > { %v1358_v18 = vadd.f32 %v1326_v3, %v3038_v15 }
 0x24f   : > { %v1235_v2 = vpop.permute.xlu1 %1234  ;;  %v1356_v14 = vadd.f32 %v1324_v1, %v3041_v17  ;;  %v1175_v1 = vld [vmem:[%s3321_s23 + $0x58] sm:$0xff] }
 0x250   : > { %v1327_v7 = vmul.f32 %v1235_v2, %v1167_v60  ;;  %v1231_v9 = vpop.permute.xlu0 %1230 }
 0x251   : > { %v1325_v11 = vmul.f32 %v1231_v9, %v1165_v0 }
 0x252   : > { %v1359_v12 = vadd.f32 %v1327_v7, %v3048_v20  ;;  %v1171_v20 = vld [vmem:[%s3321_s23 + $0x38] sm:$0xff] }
 0x253   : > { %v1357_v28 = vadd.f32 %v1325_v11, %v3055_v23 }
 0x254   : > { %v1237_v21 = vpop.permute.xlu0 %1236  ;;  %v1389_v30 = vpack.c.bf16 %v1359_v12, %v1358_v18 }
 0x255   : > { %v1388_v24 = vpack.c.bf16 %v1357_v28, %v1356_v14  ;;  %v1328_v26 = vmul.f32 %v1237_v21, %v1168_v13  ;;  %v1177_v13 = vld [vmem:[%s3321_s23 + $0x68] sm:$0xff] }
 0x256   : > { %v1239_v31 = vpop.permute.xlu1 %1238 }
 0x257   : > { %v1329_v37 = vmul.f32 %v1239_v31, %v1169_v22  ;;  %2499 = vmatprep.mubr.msk.bf16.mxu0 %vm1419_vm2, %v1388_v24  ;;  %v1360_v15 = vadd.f32 %v1328_v26, %v3069_v34  ;;  %v1179_v26 = vld [vmem:[%s3321_s23 + $0x78] sm:$0xff] }
 0x258   : > { %2500 = vmatmul.mubr.msk.bf16.vlgmr.msra.gmra.mrb[36].mxu0 %vm1419_vm2, %v1389_v30  ;;  %v1241_v17 = vpop.permute.xlu0 %1240 }
 0x259   : > { %v1361_v23 = vadd.f32 %v1329_v37, %v3086_v41  ;;  %v1330_v40 = vmul.f32 %v1241_v17, %v1170_v33 }
 0x25a   : > { %v1243_v42 = vpop.permute.xlu1 %1242 }
 0x25b   : > { %v1390_v45 = vpack.c.bf16 %v1361_v23, %v1360_v15  ;;  %v1331_v46 = vmul.f32 %v1243_v42, %v1171_v20  ;;  %v1362_v50 = vadd.f32 %v1330_v40, %v3066_v32  ;;  %v1181_v15 = vld [vmem:[%s3321_s23 + $0x88] sm:$0xff] }
 0x25c   : > { %v1245_v47 = vpop.permute.xlu0 %1244 }
 0x25d   : > { %v1363_v52 = vadd.f32 %v1331_v46, %v3075_v36  ;;  %v1332_v54 = vmul.f32 %v1245_v47, %v1172_v43  ;;  %2503 = vmatprep.mubr.msk.bf16.mxu0 %vm1419_vm2, %v1390_v45  ;;  %v1176_v36 = vld [vmem:[%s3321_s23 + $0x60] sm:$0xff]  ;;  %v1183_v47 = vld [vmem:[%s3321_s23 + $0x98] sm:$0xff] }
 0x25e   : > { %v1247_v34 = vpop.permute.xlu1 %1246 }
 0x25f   : > { %v1391_v41 = vpack.c.bf16 %v1363_v52, %v1362_v50  ;;  %v1333_v60 = vmul.f32 %v1247_v34, %v1173_v48  ;;  %v1364_v2 = vadd.f32 %v1332_v54, %v3100_v53 }
 0x260   : > { %v1249_v0 = vpop.permute.xlu0 %1248 }
 0x261   : > { %v1365_v3 = vadd.f32 %v1333_v60, %v3116_v59  ;;  %v1334_v7 = vmul.f32 %v1249_v0, %v1174_v57  ;;  %2504 = vmatmul.mubr.msk.bf16.gmra.mrb[40].mxu0 %vm1419_vm2, %v1391_v41  ;;  %v1178_v59 = vld [vmem:[%s3321_s23 + $0x70] sm:$0xff]  ;;  %v1185_v41 = vld [vmem:[%s3321_s23 + $0xa8] sm:$0xff] }
 0x262   : > { %v1251_v32 = vpop.permute.xlu1 %1250 }
 0x263   : > { %v1392_v9 = vpack.c.bf16 %v1365_v3, %v1364_v2  ;;  %v1335_v11 = vmul.f32 %v1251_v32, %v1175_v1  ;;  %v1366_v14 = vadd.f32 %v1334_v7, %v3097_v49  ;;  %v1187_v32 = vld [vmem:[%s3321_s23 + $0xb8] sm:$0xff] }
 0x264   : > { %v1253_v12 = vpop.permute.xlu0 %1252 }
 0x265   : > { %v1367_v28 = vadd.f32 %v1335_v11, %v3107_v55  ;;  %v1336_v18 = vmul.f32 %v1253_v12, %v1176_v36  ;;  %2507 = vmatprep.mubr.msk.bf16.mxu0 %vm1419_vm2, %v1392_v9  ;;  %v1180_v55 = vld [vmem:[%s3321_s23 + $0x80] sm:$0xff] }
 0x266   : > { %v1255_v53 = vpop.permute.xlu1 %1254 }
 0x267   : > { %v1393_v21 = vpack.c.bf16 %v1367_v28, %v1366_v14  ;;  %v1337_v22 = vmul.f32 %v1255_v53, %v1177_v13  ;;  %v1368_v30 = vadd.f32 %v1336_v18, %v3132_v8  ;;  %v1189_v28 = vld [vmem:[%s3321_s23 + $0xc8] sm:$0xff] }
 0x268   : > { %v1257_v24 = vpop.permute.xlu0 %1256 }
 0x269   : > { %v1369_v31 = vadd.f32 %v1337_v22, %v3147_v16  ;;  %v1338_v33 = vmul.f32 %v1257_v24, %v1178_v59  ;;  %2508 = vmatmul.mubr.msk.bf16.gmra.mrb[44].mxu0 %vm1419_vm2, %v1393_v21  ;;  %v1182_v16 = vld [vmem:[%s3321_s23 + $0x90] sm:$0xff] }
 0x26a   : > { %v1259_v49 = vpop.permute.xlu1 %1258 }
 0x26b   : > { %v1394_v37 = vpack.c.bf16 %v1369_v31, %v1368_v30  ;;  %v1339_v17 = vmul.f32 %v1259_v49, %v1179_v26  ;;  %v1370_v23 = vadd.f32 %v1338_v33, %v3129_v4  ;;  %v1191_v26 = vld [vmem:[%s3321_s23 + $0xd8] sm:$0xff] }
 0x26c   : > { %v1261_v20 = vpop.permute.xlu0 %1260 }
 0x26d   : > { %v1371_v40 = vadd.f32 %v1339_v17, %v3138_v10  ;;  %v1340_v42 = vmul.f32 %v1261_v20, %v1180_v55  ;;  %2511 = vmatprep.mubr.msk.bf16.mxu0 %vm1419_vm2, %v1394_v37  ;;  %v1184_v10 = vld [vmem:[%s3321_s23 + $0xa0] sm:$0xff]  ;;  %v1193_v17 = vld [vmem:[%s3321_s23 + $0xe8] sm:$0xff] }
 0x26e   : > { %v1263_v8 = vpop.permute.xlu1 %1262 }
 0x26f   : > { %v1395_v43 = vpack.c.bf16 %v1371_v40, %v1370_v23  ;;  %v1341_v45 = vmul.f32 %v1263_v8, %v1181_v15  ;;  %v1372_v48 = vadd.f32 %v1340_v42, %v3164_v35  ;;  %v1194_v40 = vld [vmem:[%s3321_s23 + $0xf0] sm:$0xff] }
 0x270   : > { %v1265_v46 = vpop.permute.xlu0 %1264 }
 0x271   : > { %v1373_v50 = vadd.f32 %v1341_v45, %v3179_v44  ;;  %v1342_v52 = vmul.f32 %v1265_v46, %v1182_v16  ;;  %2512 = vmatmul.mubr.msk.bf16.gmra.mrb[48].mxu0 %vm1419_vm2, %v1395_v43  ;;  %v1186_v44 = vld [vmem:[%s3321_s23 + $0xb0] sm:$0xff]  ;;  %v1195_v16 = vld [vmem:[%s3321_s23 + $0xf8] sm:$0xff] }
 0x272   : > { %v1267_v4 = vpop.permute.xlu1 %1266 }
 0x273   : > { %v1396_v54 = vpack.c.bf16 %v1373_v50, %v1372_v48  ;;  %v1343_v34 = vmul.f32 %v1267_v4, %v1183_v47  ;;  %v1374_v60 = vadd.f32 %v1342_v52, %v3160_v29 }
 0x274   : > { %v1269_v57 = vpop.permute.xlu0 %1268 }
 0x275   : > { %v1375_v0 = vadd.f32 %v1343_v34, %v3170_v38  ;;  %v1344_v1 = vmul.f32 %v1269_v57, %v1184_v10  ;;  %2515 = vmatprep.mubr.msk.bf16.mxu0 %vm1419_vm2, %v1396_v54  ;;  %v1188_v38 = vld [vmem:[%s3321_s23 + $0xc0] sm:$0xff] }
 0x276   : > { %v1271_v35 = vpop.permute.xlu1 %1270 }
 0x277   : > { %v1397_v2 = vpack.c.bf16 %v1375_v0, %v1374_v60  ;;  %v1345_v3 = vmul.f32 %v1271_v35, %v1185_v41  ;;  %v1376_v36 = vadd.f32 %v1344_v1, %v3196_v61 }
 0x278   : > { %v1273_v7 = vpop.permute.xlu0 %1272 }
 0x279   : > { %v1377_v9 = vadd.f32 %v1345_v3, %v3211_v5  ;;  %v1346_v11 = vmul.f32 %v1273_v7, %v1186_v44  ;;  %2516 = vmatmul.mubr.msk.bf16.gmra.mrb[52].mxu0 %vm1419_vm2, %v1397_v2  ;;  %v1190_v5 = vld [vmem:[%s3321_s23 + $0xd0] sm:$0xff] }
 0x27a   : > { %v1275_v29 = vpop.permute.xlu1 %1274 }
 0x27b   : > { %v1398_v12 = vpack.c.bf16 %v1377_v9, %v1376_v36  ;;  %v1347_v13 = vmul.f32 %v1275_v29, %v1187_v32  ;;  %v1378_v18 = vadd.f32 %v1346_v11, %v3192_v56 }
 0x27c   : > { %v1277_v14 = vpop.permute.xlu0 %1276 }
 0x27d   : > { %v1379_v53 = vadd.f32 %v1347_v13, %v3202_v63  ;;  %v1348_v59 = vmul.f32 %v1277_v14, %v1188_v38  ;;  %2519 = vmatprep.mubr.msk.bf16.mxu0 %vm1419_vm2, %v1398_v12  ;;  %v1192_v63 = vld [vmem:[%s3321_s23 + $0xe0] sm:$0xff] }
 0x27e   : > { %v1279_v61 = vpop.permute.xlu1 %1278 }
 0x27f   : > { %v1399_v21 = vpack.c.bf16 %v1379_v53, %v1378_v18  ;;  %v1349_v22 = vmul.f32 %v1279_v61, %v1189_v28  ;;  %v1380_v30 = vadd.f32 %v1348_v59, %v3228_v25 }
 0x280   : > { %v1281_v24 = vpop.permute.xlu0 %1280 }
 0x281   : > { %v1381_v31 = vadd.f32 %v1349_v22, %v3243_v39  ;;  %v1350_v33 = vmul.f32 %v1281_v24, %v1190_v5  ;;  %2520 = vmatmul.mubr.msk.bf16.gmra.mrb[56].mxu0 %vm1419_vm2, %v1399_v21 }
 0x282   : > { %v1283_v56 = vpop.permute.xlu1 %1282 }
 0x283   : > { %v1400_v49 = vpack.c.bf16 %v1381_v31, %v1380_v30  ;;  %v1351_v55 = vmul.f32 %v1283_v56, %v1191_v26  ;;  %v1382_v20 = vadd.f32 %v1350_v33, %v3224_v19 }
 0x284   : > { %v1285_v37 = vpop.permute.xlu0 %1284 }
 0x285   : > { %v1383_v15 = vadd.f32 %v1351_v55, %v3234_v27  ;;  %v1352_v23 = vmul.f32 %v1285_v37, %v1192_v63  ;;  %2523 = vmatprep.mubr.msk.bf16.mxu0 %vm1419_vm2, %v1400_v49 }
 0x286   : > { %v1287_v25 = vpop.permute.xlu1 %1286 }
 0x287   : > { %v1401_v39 = vpack.c.bf16 %v1383_v15, %v1382_v20  ;;  %v1353_v42 = vmul.f32 %v1287_v25, %v1193_v17  ;;  %v1384_v43 = vadd.f32 %v1352_v23, %v3260_v58  ;;  %v2640_v58 = vld [vmem:[%s3561_s8 + $0x38] sm:$0xff]  }
 0x288   : > { %v1289_v8 = vpop.permute.xlu0 %1288  ;;  %2545 = vmatprep.subr.bf16.mxu1 %v2640_v58 }
 0x289   : > { %v1385_v45 = vadd.f32 %v1353_v42, %v3275_v6  ;;  %v1354_v46 = vmul.f32 %v1289_v8, %v1194_v40  ;;  %2524 = vmatmul.mubr.msk.bf16.gmra.mrb[60].mxu0 %vm1419_vm2, %v1401_v39  ;;  %2546 = vmatpush3.bf16.msra.mxu1 %v2640_v58  ;;  %v3409_v6 = vld [vmem:[%s3560_s7] ss:$0 sm:$0xff] }
 0x28a   : > { %v1291_v47 = vpop.permute.xlu1 %1290 }
 0x28b   : > { %v1402_v19 = vpack.c.bf16 %v1385_v45, %v1384_v43  ;;  %v1355_v48 = vmul.f32 %v1291_v47, %v1195_v16  ;;  %v1386_v27 = vadd.f32 %v1354_v46, %v3256_v51 }
 0x28d   : > { %v1387_v50 = vadd.f32 %v1355_v48, %v3266_v62  ;;  %2527 = vmatprep.mubr.msk.bf16.mxu0 %vm1419_vm2, %v1402_v19 }
 0x28f   : > { %v1403_v52 = vpack.c.bf16 %v1387_v50, %v1386_v27 }
 0x291   : > { %2528 = vmatmul.mubr.msk.bf16.gmra.mrb[64].mxu0 %vm1419_vm2, %v1403_v52 }
 0x32b   : > { %v2501_v4 = vpop.f32.mrb[36].mxu0 }
 0x32c   : > { %v1511_v51 = vadd.f32 %v2501_v4, %v3409_v6  ;;  %v1502_v62 = vpop.f32.mrb[37].mxu0 }
 0x32d   : > { %v1503_v10 = vadd.f32 %v3409_v6, %v1502_v62  ;;  %v2502_v54 = vpop.f32.mrb[38].mxu0 }
 0x32e   : > { %v1514_v34 = vadd.f32 %v2502_v54, %v3409_v6  ;;  %v1505_v57 = vpop.f32.mrb[39].mxu0  ;;  %v1631_v60 = vmax.f32 %v1511_v51, 0.0 }
 0x32f   : > { %v1506_v41 = vadd.f32 %v3409_v6, %v1505_v57  ;;  %v1629_v1 = vmax.f32 %v1503_v10, 0.0 }
 0x330   : > { %v1632_v0 = vmax.f32 %v1514_v34, 0.0 }
 0x331   : > { %v1630_v35 = vmax.f32 %v1506_v41, 0.0 }
 0x332   : > { %v1662_v44 = vpack.c.bf16 %v1632_v0, %v1631_v60 }
 0x333   : > { %v1661_v2 = vpack.c.bf16 %v1630_v35, %v1629_v1 }
 0x334   : > { %v2505_v3 = vpop.f32.mrb[40].mxu0 }
 0x335   : > { %v1527_v7 = vadd.f32 %v2505_v3, %v3409_v6  ;;  %v1518_v32 = vpop.f32.mrb[41].mxu0  ;;  %2547 = vmatprep.mubr.bf16.mxu1 %v1661_v2 }
 0x336   : > { %v1519_v36 = vadd.f32 %v3409_v6, %v1518_v32  ;;  %v2506_v9 = vpop.f32.mrb[42].mxu0  ;;  %2548 = vmatmul.mubr.bf16.vlgmr.msra.gmra.mrb[28].mxu1 %v1662_v44 }
 0x337   : > { %v1530_v11 = vadd.f32 %v2506_v9, %v3409_v6  ;;  %v1521_v29 = vpop.f32.mrb[43].mxu0  ;;  %v1635_v12 = vmax.f32 %v1527_v7, 0.0 }
 0x338   : > { %v1522_v38 = vadd.f32 %v3409_v6, %v1521_v29  ;;  %v1633_v14 = vmax.f32 %v1519_v36, 0.0 }
 0x339   : > { %v1636_v13 = vmax.f32 %v1530_v11, 0.0 }
 0x33a   : > { %v1634_v28 = vmax.f32 %v1522_v38, 0.0 }
 0x33b   : > { %v1664_v18 = vpack.c.bf16 %v1636_v13, %v1635_v12 }
 0x33c   : > { %v1663_v53 = vpack.c.bf16 %v1634_v28, %v1633_v14  ;;  %v2509_v59 = vpop.f32.mrb[44].mxu0 }
 0x33d   : > { %v1543_v61 = vadd.f32 %v2509_v59, %v3409_v6  ;;  %v1534_v5 = vpop.f32.mrb[45].mxu0 }
 0x33e   : > { %v1535_v21 = vadd.f32 %v3409_v6, %v1534_v5  ;;  %v2510_v22 = vpop.f32.mrb[46].mxu0  ;;  %2551 = vmatprep.mubr.bf16.mxu1 %v1663_v53 }
 0x33f   : > { %v1546_v24 = vadd.f32 %v2510_v22, %v3409_v6  ;;  %v1537_v26 = vpop.f32.mrb[47].mxu0  ;;  %2552 = vmatmul.mubr.bf16.gmra.mrb[32].mxu1 %v1664_v18  ;;  %v1639_v31 = vmax.f32 %v1543_v61, 0.0 }
 0x340   : > { %v1538_v30 = vadd.f32 %v3409_v6, %v1537_v26  ;;  %v1637_v56 = vmax.f32 %v1535_v21, 0.0 }
 0x341   : > { %v1640_v33 = vmax.f32 %v1546_v24, 0.0 }
 0x342   : > { %v1638_v63 = vmax.f32 %v1538_v30, 0.0 }
 0x343   : > { %v1666_v49 = vpack.c.bf16 %v1640_v33, %v1639_v31 }
 0x344   : > { %v1665_v55 = vpack.c.bf16 %v1638_v63, %v1637_v56  ;;  %v2513_v37 = vpop.f32.mrb[48].mxu0 }
 0x345   : > { %v1559_v17 = vadd.f32 %v2513_v37, %v3409_v6  ;;  %v1550_v20 = vpop.f32.mrb[49].mxu0 }
 0x346   : > { %v1551_v15 = vadd.f32 %v3409_v6, %v1550_v20  ;;  %v2514_v23 = vpop.f32.mrb[50].mxu0  ;;  %2555 = vmatprep.mubr.bf16.mxu1 %v1665_v55 }
 0x347   : > { %v1562_v25 = vadd.f32 %v2514_v23, %v3409_v6  ;;  %v1553_v40 = vpop.f32.mrb[51].mxu0  ;;  %2556 = vmatmul.mubr.bf16.gmra.mrb[36].mxu1 %v1666_v49  ;;  %v1643_v42 = vmax.f32 %v1559_v17, 0.0 }
 0x348   : > { %v1554_v39 = vadd.f32 %v3409_v6, %v1553_v40  ;;  %v1641_v16 = vmax.f32 %v1551_v15, 0.0 }
 0x349   : > { %v1644_v8 = vmax.f32 %v1562_v25, 0.0 }
 0x34a   : > { %v1642_v43 = vmax.f32 %v1554_v39, 0.0  ;;  %v3446_v39 = vld [vmem:[%s3562_s9] ss:$0 sm:$0xff] }
 0x34b   : > { %v1668_v45 = vpack.c.bf16 %v1644_v8, %v1643_v42 }
 0x34c   : > { %v1667_v46 = vpack.c.bf16 %v1642_v43, %v1641_v16  ;;  %v2517_v47 = vpop.f32.mrb[52].mxu0 }
 0x34d   : > { %v1575_v19 = vadd.f32 %v2517_v47, %v3409_v6  ;;  %v1566_v48 = vpop.f32.mrb[53].mxu0 }
 0x34e   : > { %v1567_v27 = vadd.f32 %v3409_v6, %v1566_v48  ;;  %v2518_v50 = vpop.f32.mrb[54].mxu0  ;;  %2559 = vmatprep.mubr.bf16.mxu1 %v1667_v46 }
 0x34f   : > { %v1578_v52 = vadd.f32 %v2518_v50, %v3409_v6  ;;  %v1569_v58 = vpop.f32.mrb[55].mxu0  ;;  %2560 = vmatmul.mubr.bf16.gmra.mrb[40].mxu1 %v1668_v45  ;;  %v1647_v51 = vmax.f32 %v1575_v19, 0.0 }
 0x350   : > { %v1570_v4 = vadd.f32 %v3409_v6, %v1569_v58  ;;  %v1645_v10 = vmax.f32 %v1567_v27, 0.0 }
 0x351   : > { %v1648_v62 = vmax.f32 %v1578_v52, 0.0 }
 0x352   : > { %v1646_v54 = vmax.f32 %v1570_v4, 0.0 }
 0x353   : > { %v1670_v34 = vpack.c.bf16 %v1648_v62, %v1647_v51 }
 0x354   : > { %v1669_v57 = vpack.c.bf16 %v1646_v54, %v1645_v10  ;;  %v2521_v41 = vpop.f32.mrb[56].mxu0 }
 0x355   : > { %v1591_v60 = vadd.f32 %v2521_v41, %v3409_v6  ;;  %v1582_v0 = vpop.f32.mrb[57].mxu0 }
 0x356   : > { %v1583_v1 = vadd.f32 %v3409_v6, %v1582_v0  ;;  %v2522_v35 = vpop.f32.mrb[58].mxu0  ;;  %2563 = vmatprep.mubr.bf16.mxu1 %v1669_v57 }
 0x357   : > { %v1594_v44 = vadd.f32 %v2522_v35, %v3409_v6  ;;  %v1585_v2 = vpop.f32.mrb[59].mxu0  ;;  %2564 = vmatmul.mubr.bf16.gmra.mrb[44].mxu1 %v1670_v34  ;;  %v1651_v7 = vmax.f32 %v1591_v60, 0.0 }
 0x358   : > { %v1586_v3 = vadd.f32 %v3409_v6, %v1585_v2  ;;  %v1649_v36 = vmax.f32 %v1583_v1, 0.0 }
 0x359   : > { %v1652_v32 = vmax.f32 %v1594_v44, 0.0 }
 0x35a   : > { %v1650_v9 = vmax.f32 %v1586_v3, 0.0 }
 0x35b   : > { %v1672_v11 = vpack.c.bf16 %v1652_v32, %v1651_v7 }
 0x35c   : > { %v1671_v29 = vpack.c.bf16 %v1650_v9, %v1649_v36  ;;  %v2525_v38 = vpop.f32.mrb[60].mxu0 }
 0x35d   : > { %v1607_v12 = vadd.f32 %v2525_v38, %v3409_v6  ;;  %v1598_v13 = vpop.f32.mrb[61].mxu0 }
 0x35e   : > { %v1599_v14 = vadd.f32 %v3409_v6, %v1598_v13  ;;  %v2526_v28 = vpop.f32.mrb[62].mxu0  ;;  %2567 = vmatprep.mubr.bf16.mxu1 %v1671_v29 }
 0x35f   : > { %v1610_v18 = vadd.f32 %v2526_v28, %v3409_v6  ;;  %v1601_v53 = vpop.f32.mrb[63].mxu0  ;;  %2568 = vmatmul.mubr.bf16.gmra.mrb[48].mxu1 %v1672_v11  ;;  %v1655_v61 = vmax.f32 %v1607_v12, 0.0 }
 0x360   : > { %v1602_v59 = vadd.f32 %v3409_v6, %v1601_v53  ;;  %v1653_v21 = vmax.f32 %v1599_v14, 0.0 }
 0x361   : > { %v1656_v5 = vmax.f32 %v1610_v18, 0.0 }
 0x362   : > { %v1654_v22 = vmax.f32 %v1602_v59, 0.0 }
 0x363   : > { %v1674_v24 = vpack.c.bf16 %v1656_v5, %v1655_v61 }
 0x364   : > { %v1673_v26 = vpack.c.bf16 %v1654_v22, %v1653_v21  ;;  %v2529_v30 = vpop.f32.mrb[64].mxu0 }
 0x365   : > { %v1623_v31 = vadd.f32 %v2529_v30, %v3409_v6  ;;  %v1614_v33 = vpop.f32.mrb[65].mxu0 }
 0x366   : > { %v1615_v56 = vadd.f32 %v3409_v6, %v1614_v33  ;;  %v2530_v63 = vpop.f32.mrb[66].mxu0  ;;  %2571 = vmatprep.mubr.bf16.mxu1 %v1673_v26 }
 0x367   : > { %v1626_v49 = vadd.f32 %v2530_v63, %v3409_v6  ;;  %v1617_v55 = vpop.f32.mrb[67].mxu0  ;;  %2572 = vmatmul.mubr.bf16.gmra.mrb[52].mxu1 %v1674_v24  ;;  %v1659_v17 = vmax.f32 %v1623_v31, 0.0 }
 0x368   : > { %v1618_v37 = vadd.f32 %v3409_v6, %v1617_v55  ;;  %v1657_v15 = vmax.f32 %v1615_v56, 0.0 }
 0x369   : > { %v1660_v20 = vmax.f32 %v1626_v49, 0.0 }
 0x36a   : > { %v1658_v23 = vmax.f32 %v1618_v37, 0.0 }
 0x36b   : > { %v1676_v25 = vpack.c.bf16 %v1660_v20, %v1659_v17 }
 0x36c   : > { %v1675_v40 = vpack.c.bf16 %v1658_v23, %v1657_v15 }
 0x36e   : > { %2575 = vmatprep.mubr.bf16.mxu1 %v1675_v40 }
 0x36f   : > { %2576 = vmatmul.mubr.bf16.gmra.mrb[56].mxu1 %v1676_v25 }
 0x409   : > { %v2549_v42 = vpop.f32.mrb[28].mxu1 }
 0x40a   : > { %v1791_v8 = vadd.f32 %v2549_v42, %v3446_v39  ;;  %v1782_v16 = vpop.f32.mrb[29].mxu1 }
 0x40b   : > { %v1783_v43 = vadd.f32 %v3446_v39, %v1782_v16  ;;  %v2550_v6 = vpop.f32.mrb[30].mxu1 }
 0x40c   : > { %v1911_v45 = vsub.f32 0.0, %v1791_v8  ;;  %v1794_v46 = vadd.f32 %v2550_v6, %v3446_v39  ;;  %v1785_v47 = vpop.f32.mrb[31].mxu1 }
 0x40d   : > { %v1909_v19 = vsub.f32 0.0, %v1783_v43  ;;  %v1786_v48 = vadd.f32 %v3446_v39, %v1785_v47 }
 0x40e   : > { %v1945_v27 = vmul.f32 1.442695, %v1911_v45  ;;  %v1912_v50 = vsub.f32 0.0, %v1794_v46 }
 0x40f   : > { %v1941_v52 = vmul.f32 1.442695, %v1909_v19  ;;  %v1910_v58 = vsub.f32 0.0, %v1786_v48 }
 0x410   : > { %2705 = vpow2.f32 %v1945_v27  ;;  %v1947_v4 = vmul.f32 1.442695, %v1912_v50 }
 0x411   : > { %2707 = vpow2.f32 %v1941_v52  ;;  %v1943_v51 = vmul.f32 1.442695, %v1910_v58 }
 0x412   : > { %2709 = vpow2.f32 %v1947_v4  ;;  %v2553_v62 = vpop.f32.mrb[32].mxu1 }
 0x413   : > { %2711 = vpow2.f32 %v1943_v51  ;;  %v1807_v10 = vadd.f32 %v2553_v62, %v3446_v39  ;;  %v1798_v54 = vpop.f32.mrb[33].mxu1 }
 0x414   : > { %v1799_v34 = vadd.f32 %v3446_v39, %v1798_v54  ;;  %v2554_v57 = vpop.f32.mrb[34].mxu1 }
 0x415   : > { %v1915_v41 = vsub.f32 0.0, %v1807_v10  ;;  %v1810_v60 = vadd.f32 %v2554_v57, %v3446_v39  ;;  %v1801_v0 = vpop.f32.mrb[35].mxu1 }
 0x416   : > { %v1913_v1 = vsub.f32 0.0, %v1799_v34  ;;  %v1802_v35 = vadd.f32 %v3446_v39, %v1801_v0 }
 0x417   : > { %v1953_v44 = vmul.f32 1.442695, %v1915_v41  ;;  %v1916_v2 = vsub.f32 0.0, %v1810_v60 }
 0x418   : > { %v1949_v3 = vmul.f32 1.442695, %v1913_v1  ;;  %v1914_v7 = vsub.f32 0.0, %v1802_v35 }
 0x419   : > { %2713 = vpow2.f32 %v1953_v44  ;;  %v1955_v32 = vmul.f32 1.442695, %v1916_v2 }
 0x41a   : > { %v2706_v36 = vpop.eup %2705  ;;  %2715 = vpow2.f32 %v1949_v3  ;;  %v1951_v9 = vmul.f32 1.442695, %v1914_v7  ;;  %v2557_v11 = vpop.f32.mrb[36].mxu1 }
 0x41b   : > { %v2708_v29 = vpop.eup %2707  ;;  %v2007_v38 = vadd.f32 1.0, %v2706_v36  ;;  %2717 = vpow2.f32 %v1955_v32  ;;  %v1823_v12 = vadd.f32 %v2557_v11, %v3446_v39  ;;  %v1814_v13 = vpop.f32.mrb[37].mxu1 }
 0x41c   : > { %v2710_v14 = vpop.eup %2709  ;;  %v2005_v28 = vadd.f32 1.0, %v2708_v29  ;;  %2719 = vpow2.f32 %v1951_v9  ;;  %v1815_v18 = vadd.f32 %v3446_v39, %v1814_v13  ;;  %v2558_v53 = vpop.f32.mrb[38].mxu1 }
 0x41d   : > { %v2712_v59 = vpop.eup %2711  ;;  %2721 = vrcp.f32 %v2007_v38  ;;  %v2008_v61 = vadd.f32 1.0, %v2710_v14  ;;  %v1919_v5 = vsub.f32 0.0, %v1823_v12  ;;  %v1826_v21 = vadd.f32 %v2558_v53, %v3446_v39  ;;  %v1817_v22 = vpop.f32.mrb[39].mxu1 }
 0x41e   : > { %2723 = vrcp.f32 %v2005_v28  ;;  %v2006_v24 = vadd.f32 1.0, %v2712_v59  ;;  %v1917_v26 = vsub.f32 0.0, %v1815_v18  ;;  %v1818_v30 = vadd.f32 %v3446_v39, %v1817_v22 }
 0x41f   : > { %2725 = vrcp.f32 %v2008_v61  ;;  %v1961_v31 = vmul.f32 1.442695, %v1919_v5  ;;  %v1920_v33 = vsub.f32 0.0, %v1826_v21 }
 0x420   : > { %2727 = vrcp.f32 %v2006_v24  ;;  %v1957_v56 = vmul.f32 1.442695, %v1917_v26  ;;  %v1918_v63 = vsub.f32 0.0, %v1818_v30 }
 0x421   : > { %2729 = vpow2.f32 %v1961_v31  ;;  %v1963_v49 = vmul.f32 1.442695, %v1920_v33 }
 0x422   : > { %2731 = vpow2.f32 %v1957_v56  ;;  %v1959_v55 = vmul.f32 1.442695, %v1918_v63  ;;  %v2561_v37 = vpop.f32.mrb[40].mxu1 }
 0x423   : > { %v2714_v17 = vpop.eup %2713  ;;  %2733 = vpow2.f32 %v1963_v49  ;;  %v1839_v20 = vadd.f32 %v2561_v37, %v3446_v39  ;;  %v1830_v15 = vpop.f32.mrb[41].mxu1 }
 0x424   : > { %v2716_v23 = vpop.eup %2715  ;;  %v2011_v25 = vadd.f32 1.0, %v2714_v17  ;;  %2735 = vpow2.f32 %v1959_v55  ;;  %v1831_v40 = vadd.f32 %v3446_v39, %v1830_v15  ;;  %v2562_v42 = vpop.f32.mrb[42].mxu1 }
 0x425   : > { %v2718_v8 = vpop.eup %2717  ;;  %v2009_v16 = vadd.f32 1.0, %v2716_v23  ;;  %v1923_v43 = vsub.f32 0.0, %v1839_v20  ;;  %v1842_v6 = vadd.f32 %v2562_v42, %v3446_v39  ;;  %v1833_v45 = vpop.f32.mrb[43].mxu1 }
 0x426   : > { %v2720_v46 = vpop.eup %2719  ;;  %2737 = vrcp.f32 %v2011_v25  ;;  %v2012_v47 = vadd.f32 1.0, %v2718_v8  ;;  %v1921_v19 = vsub.f32 0.0, %v1831_v40  ;;  %v1834_v48 = vadd.f32 %v3446_v39, %v1833_v45 }
 0x427   : > { %v2722_v27 = vpop.eup %2721  ;;  %2739 = vrcp.f32 %v2009_v16  ;;  %v2010_v50 = vadd.f32 1.0, %v2720_v46  ;;  %v1969_v52 = vmul.f32 1.442695, %v1923_v43  ;;  %v1924_v58 = vsub.f32 0.0, %v1842_v6 }
 0x428   : > { %v2724_v4 = vpop.eup %2723  ;;  %2071 = vst.msk [vmem:[%s3466_s14 + $0x10] sm:$0xff] %vm578_vm0, %v2722_v27  ;;  %2741 = vrcp.f32 %v2012_v47  ;;  %v1965_v51 = vmul.f32 1.442695, %v1921_v19  ;;  %v1922_v62 = vsub.f32 0.0, %v1834_v48 }
 0x429   : > { %v2726_v10 = vpop.eup %2725  ;;  %2069 = vst.msk [vmem:[%s3466_s14] sm:$0xff] %vm578_vm0, %v2724_v4  ;;  %2743 = vrcp.f32 %v2010_v50  ;;  %v1971_v54 = vmul.f32 1.442695, %v1924_v58 }
 0x42a   : > { %v2728_v34 = vpop.eup %2727  ;;  %2072 = vst.msk [vmem:[%s3466_s14 + $0x18] sm:$0xff] %vm578_vm0, %v2726_v10  ;;  %2745 = vpow2.f32 %v1969_v52  ;;  %v1967_v57 = vmul.f32 1.442695, %v1922_v62  ;;  %v2565_v41 = vpop.f32.mrb[44].mxu1 }
 0x42b   : > { %v2730_v60 = vpop.eup %2729  ;;  %2070 = vst.msk [vmem:[%s3466_s14 + $0x8] sm:$0xff] %vm578_vm0, %v2728_v34  ;;  %2747 = vpow2.f32 %v1965_v51  ;;  %v1855_v0 = vadd.f32 %v2565_v41, %v3446_v39  ;;  %v1846_v1 = vpop.f32.mrb[45].mxu1 }
 0x42c   : > { %v2732_v35 = vpop.eup %2731  ;;  %v2015_v44 = vadd.f32 1.0, %v2730_v60  ;;  %2749 = vpow2.f32 %v1971_v54  ;;  %v1847_v2 = vadd.f32 %v3446_v39, %v1846_v1  ;;  %v2566_v3 = vpop.f32.mrb[46].mxu1 }
 0x42d   : > { %v2734_v7 = vpop.eup %2733  ;;  %v2013_v32 = vadd.f32 1.0, %v2732_v35  ;;  %2751 = vpow2.f32 %v1967_v57  ;;  %v1927_v36 = vsub.f32 0.0, %v1855_v0  ;;  %v1858_v9 = vadd.f32 %v2566_v3, %v3446_v39  ;;  %v1849_v11 = vpop.f32.mrb[47].mxu1 }
 0x42e   : > { %v2736_v29 = vpop.eup %2735  ;;  %2753 = vrcp.f32 %v2015_v44  ;;  %v2016_v38 = vadd.f32 1.0, %v2734_v7  ;;  %v1925_v12 = vsub.f32 0.0, %v1847_v2  ;;  %v1850_v13 = vadd.f32 %v3446_v39, %v1849_v11 }
 0x42f   : > { %2755 = vrcp.f32 %v2013_v32  ;;  %v2014_v14 = vadd.f32 1.0, %v2736_v29  ;;  %v1977_v28 = vmul.f32 1.442695, %v1927_v36  ;;  %v1928_v18 = vsub.f32 0.0, %v1858_v9 }
 0x430   : > { %v2738_v53 = vpop.eup %2737  ;;  %2757 = vrcp.f32 %v2016_v38  ;;  %v1973_v59 = vmul.f32 1.442695, %v1925_v12  ;;  %v1926_v61 = vsub.f32 0.0, %v1850_v13 }
 0x431   : > { %v2740_v5 = vpop.eup %2739  ;;  %2075 = vst.msk [vmem:[%s3466_s14 + $0x30] sm:$0xff] %vm578_vm0, %v2738_v53  ;;  %2759 = vrcp.f32 %v2014_v14  ;;  %v1979_v21 = vmul.f32 1.442695, %v1928_v18 }
 0x432   : > { %v2742_v22 = vpop.eup %2741  ;;  %2073 = vst.msk [vmem:[%s3466_s14 + $0x20] sm:$0xff] %vm578_vm0, %v2740_v5  ;;  %2761 = vpow2.f32 %v1977_v28  ;;  %v1975_v24 = vmul.f32 1.442695, %v1926_v61  ;;  %v2569_v26 = vpop.f32.mrb[48].mxu1 }
 0x433   : > { %v2744_v30 = vpop.eup %2743  ;;  %2076 = vst.msk [vmem:[%s3466_s14 + $0x38] sm:$0xff] %vm578_vm0, %v2742_v22  ;;  %2763 = vpow2.f32 %v1973_v59  ;;  %v1871_v31 = vadd.f32 %v2569_v26, %v3446_v39  ;;  %v1862_v33 = vpop.f32.mrb[49].mxu1 }
 0x434   : > { %v2746_v56 = vpop.eup %2745  ;;  %2074 = vst.msk [vmem:[%s3466_s14 + $0x28] sm:$0xff] %vm578_vm0, %v2744_v30  ;;  %2765 = vpow2.f32 %v1979_v21  ;;  %v1863_v63 = vadd.f32 %v3446_v39, %v1862_v33  ;;  %v2570_v49 = vpop.f32.mrb[50].mxu1 }
 0x435   : > { %v2748_v55 = vpop.eup %2747  ;;  %v2019_v37 = vadd.f32 1.0, %v2746_v56  ;;  %2767 = vpow2.f32 %v1975_v24  ;;  %v1931_v17 = vsub.f32 0.0, %v1871_v31  ;;  %v1874_v20 = vadd.f32 %v2570_v49, %v3446_v39  ;;  %v1865_v15 = vpop.f32.mrb[51].mxu1 }
 0x436   : > { %v2750_v23 = vpop.eup %2749  ;;  %v2017_v25 = vadd.f32 1.0, %v2748_v55  ;;  %v1929_v40 = vsub.f32 0.0, %v1863_v63  ;;  %v1866_v42 = vadd.f32 %v3446_v39, %v1865_v15 }
 0x437   : > { %v2752_v8 = vpop.eup %2751  ;;  %2769 = vrcp.f32 %v2019_v37  ;;  %v2020_v16 = vadd.f32 1.0, %v2750_v23  ;;  %v1985_v43 = vmul.f32 1.442695, %v1931_v17  ;;  %v1932_v6 = vsub.f32 0.0, %v1874_v20 }
 0x438   : > { %v2754_v45 = vpop.eup %2753  ;;  %2771 = vrcp.f32 %v2017_v25  ;;  %v2018_v46 = vadd.f32 1.0, %v2752_v8  ;;  %v1981_v47 = vmul.f32 1.442695, %v1929_v40  ;;  %v1930_v19 = vsub.f32 0.0, %v1866_v42 }
 0x439   : > { %v2756_v48 = vpop.eup %2755  ;;  %2079 = vst.msk [vmem:[%s3466_s14 + $0x50] sm:$0xff] %vm578_vm0, %v2754_v45  ;;  %2773 = vrcp.f32 %v2020_v16  ;;  %v1987_v27 = vmul.f32 1.442695, %v1932_v6 }
 0x43a   : > { %v2758_v50 = vpop.eup %2757  ;;  %2077 = vst.msk [vmem:[%s3466_s14 + $0x40] sm:$0xff] %vm578_vm0, %v2756_v48  ;;  %2775 = vrcp.f32 %v2018_v46  ;;  %v1983_v52 = vmul.f32 1.442695, %v1930_v19  ;;  %v2573_v58 = vpop.f32.mrb[52].mxu1 }
 0x43b   : > { %v2760_v4 = vpop.eup %2759  ;;  %2080 = vst.msk [vmem:[%s3466_s14 + $0x58] sm:$0xff] %vm578_vm0, %v2758_v50  ;;  %2777 = vpow2.f32 %v1985_v43  ;;  %v1887_v51 = vadd.f32 %v2573_v58, %v3446_v39  ;;  %v1878_v62 = vpop.f32.mrb[53].mxu1 }
 0x43c   : > { %v2762_v10 = vpop.eup %2761  ;;  %2078 = vst.msk [vmem:[%s3466_s14 + $0x48] sm:$0xff] %vm578_vm0, %v2760_v4  ;;  %2779 = vpow2.f32 %v1981_v47  ;;  %v1879_v54 = vadd.f32 %v3446_v39, %v1878_v62  ;;  %v2574_v34 = vpop.f32.mrb[54].mxu1 }
 0x43d   : > { %v2764_v57 = vpop.eup %2763  ;;  %v2023_v41 = vadd.f32 1.0, %v2762_v10  ;;  %2781 = vpow2.f32 %v1987_v27  ;;  %v1935_v60 = vsub.f32 0.0, %v1887_v51  ;;  %v1890_v0 = vadd.f32 %v2574_v34, %v3446_v39  ;;  %v1881_v1 = vpop.f32.mrb[55].mxu1 }
 0x43e   : > { %v2766_v35 = vpop.eup %2765  ;;  %v2021_v44 = vadd.f32 1.0, %v2764_v57  ;;  %2783 = vpow2.f32 %v1983_v52  ;;  %v1933_v2 = vsub.f32 0.0, %v1879_v54  ;;  %v1882_v3 = vadd.f32 %v3446_v39, %v1881_v1 }
 0x43f   : > { %v2768_v7 = vpop.eup %2767  ;;  %2785 = vrcp.f32 %v2023_v41  ;;  %v2024_v32 = vadd.f32 1.0, %v2766_v35  ;;  %v1993_v36 = vmul.f32 1.442695, %v1935_v60  ;;  %v1936_v9 = vsub.f32 0.0, %v1890_v0 }
 0x440   : > { %2787 = vrcp.f32 %v2021_v44  ;;  %v2022_v11 = vadd.f32 1.0, %v2768_v7  ;;  %v1989_v29 = vmul.f32 1.442695, %v1933_v2  ;;  %v1934_v38 = vsub.f32 0.0, %v1882_v3 }
 0x441   : > { %v2770_v12 = vpop.eup %2769  ;;  %2789 = vrcp.f32 %v2024_v32  ;;  %v1995_v13 = vmul.f32 1.442695, %v1936_v9 }
 0x442   : > { %v2772_v14 = vpop.eup %2771  ;;  %2083 = vst.msk [vmem:[%s3466_s14 + $0x70] sm:$0xff] %vm578_vm0, %v2770_v12  ;;  %2791 = vrcp.f32 %v2022_v11  ;;  %v1991_v28 = vmul.f32 1.442695, %v1934_v38  ;;  %v2577_v18 = vpop.f32.mrb[56].mxu1 }
 0x443   : > { %v2774_v53 = vpop.eup %2773  ;;  %2081 = vst.msk [vmem:[%s3466_s14 + $0x60] sm:$0xff] %vm578_vm0, %v2772_v14  ;;  %2793 = vpow2.f32 %v1993_v36  ;;  %v1903_v59 = vadd.f32 %v2577_v18, %v3446_v39  ;;  %v1894_v61 = vpop.f32.mrb[57].mxu1 }
 0x444   : > { %v2776_v5 = vpop.eup %2775  ;;  %2084 = vst.msk [vmem:[%s3466_s14 + $0x78] sm:$0xff] %vm578_vm0, %v2774_v53  ;;  %2795 = vpow2.f32 %v1989_v29  ;;  %v1895_v21 = vadd.f32 %v3446_v39, %v1894_v61  ;;  %v2578_v22 = vpop.f32.mrb[58].mxu1 }
 0x445   : > { %v2778_v24 = vpop.eup %2777  ;;  %2082 = vst.msk [vmem:[%s3466_s14 + $0x68] sm:$0xff] %vm578_vm0, %v2776_v5  ;;  %2797 = vpow2.f32 %v1995_v13  ;;  %v1939_v26 = vsub.f32 0.0, %v1903_v59  ;;  %v1906_v30 = vadd.f32 %v2578_v22, %v3446_v39  ;;  %v1897_v31 = vpop.f32.mrb[59].mxu1 }
 0x446   : > { %v2780_v33 = vpop.eup %2779  ;;  %v2027_v56 = vadd.f32 1.0, %v2778_v24  ;;  %2799 = vpow2.f32 %v1991_v28  ;;  %v1937_v63 = vsub.f32 0.0, %v1895_v21  ;;  %v1898_v49 = vadd.f32 %v3446_v39, %v1897_v31 }
 0x447   : > { %v2782_v55 = vpop.eup %2781  ;;  %v2025_v37 = vadd.f32 1.0, %v2780_v33  ;;  %v1940_v17 = vsub.f32 0.0, %v1906_v30  ;;  %v2001_v23 = vmul.f32 1.442695, %v1939_v26 }
 0x448   : > { %v2784_v20 = vpop.eup %2783  ;;  %2801 = vrcp.f32 %v2027_v56  ;;  %v2028_v15 = vadd.f32 1.0, %v2782_v55  ;;  %v1938_v25 = vsub.f32 0.0, %v1898_v49  ;;  %v1997_v8 = vmul.f32 1.442695, %v1937_v63 }
 0x449   : > { %v2786_v40 = vpop.eup %2785  ;;  %2803 = vrcp.f32 %v2025_v37  ;;  %v2026_v42 = vadd.f32 1.0, %v2784_v20  ;;  %v2003_v39 = vmul.f32 1.442695, %v1940_v17 }
 0x44a   : > { %v2788_v16 = vpop.eup %2787  ;;  %2087 = vst.msk [vmem:[%s3466_s14 + $0x90] sm:$0xff] %vm578_vm0, %v2786_v40  ;;  %2805 = vrcp.f32 %v2028_v15  ;;  %v1999_v6 = vmul.f32 1.442695, %v1938_v25 }
 0x44b   : > { %v2790_v43 = vpop.eup %2789  ;;  %2085 = vst.msk [vmem:[%s3466_s14 + $0x80] sm:$0xff] %vm578_vm0, %v2788_v16  ;;  %2807 = vrcp.f32 %v2026_v42 }
 0x44c   : > { %v2792_v45 = vpop.eup %2791  ;;  %2088 = vst.msk [vmem:[%s3466_s14 + $0x98] sm:$0xff] %vm578_vm0, %v2790_v43  ;;  %2809 = vpow2.f32 %v2001_v23 }
 0x44d   : > { %v2794_v46 = vpop.eup %2793  ;;  %2086 = vst.msk [vmem:[%s3466_s14 + $0x88] sm:$0xff] %vm578_vm0, %v2792_v45  ;;  %2811 = vpow2.f32 %v1997_v8 }
 0x44e   : > { %v2796_v47 = vpop.eup %2795  ;;  %v2031_v19 = vadd.f32 1.0, %v2794_v46  ;;  %2813 = vpow2.f32 %v2003_v39 }
 0x44f   : > { %v2798_v48 = vpop.eup %2797  ;;  %v2029_v27 = vadd.f32 1.0, %v2796_v47  ;;  %2815 = vpow2.f32 %v1999_v6 }
 0x450   : > { %v2800_v50 = vpop.eup %2799  ;;  %2817 = vrcp.f32 %v2031_v19  ;;  %v2032_v52 = vadd.f32 1.0, %v2798_v48 }
 0x451   : > { %2819 = vrcp.f32 %v2029_v27  ;;  %v2030_v58 = vadd.f32 1.0, %v2800_v50 }
 0x452   : > { %v2802_v4 = vpop.eup %2801  ;;  %2821 = vrcp.f32 %v2032_v52 }
 0x453   : > { %v2804_v51 = vpop.eup %2803  ;;  %2091 = vst.msk [vmem:[%s3466_s14 + $0xb0] sm:$0xff] %vm578_vm0, %v2802_v4  ;;  %2823 = vrcp.f32 %v2030_v58 }
 0x454   : > { %v2806_v62 = vpop.eup %2805  ;;  %2089 = vst.msk [vmem:[%s3466_s14 + $0xa0] sm:$0xff] %vm578_vm0, %v2804_v51 }
 0x455   : > { %v2808_v10 = vpop.eup %2807  ;;  %2092 = vst.msk [vmem:[%s3466_s14 + $0xb8] sm:$0xff] %vm578_vm0, %v2806_v62 }
 0x456   : > { %v2810_v54 = vpop.eup %2809  ;;  %2090 = vst.msk [vmem:[%s3466_s14 + $0xa8] sm:$0xff] %vm578_vm0, %v2808_v10 }
 0x457   : > { %v2812_v34 = vpop.eup %2811  ;;  %v2035_v57 = vadd.f32 1.0, %v2810_v54 }
 0x458   : > { %v2814_v41 = vpop.eup %2813  ;;  %v2033_v60 = vadd.f32 1.0, %v2812_v34 }
 0x459   : > { %v2816_v0 = vpop.eup %2815  ;;  %2825 = vrcp.f32 %v2035_v57  ;;  %v2036_v1 = vadd.f32 1.0, %v2814_v41 }
 0x45a   : > { %v2818_v35 = vpop.eup %2817  ;;  %2827 = vrcp.f32 %v2033_v60  ;;  %v2034_v44 = vadd.f32 1.0, %v2816_v0 }
 0x45b   : > { %v2820_v2 = vpop.eup %2819  ;;  %2095 = vst.msk [vmem:[%s3466_s14 + $0xd0] sm:$0xff] %vm578_vm0, %v2818_v35  ;;  %2829 = vrcp.f32 %v2036_v1 }
 0x45c   : > { %v2822_v3 = vpop.eup %2821  ;;  %2093 = vst.msk [vmem:[%s3466_s14 + $0xc0] sm:$0xff] %vm578_vm0, %v2820_v2  ;;  %2831 = vrcp.f32 %v2034_v44 }
 0x45d   : > { %v2824_v7 = vpop.eup %2823  ;;  %2096 = vst.msk [vmem:[%s3466_s14 + $0xd8] sm:$0xff] %vm578_vm0, %v2822_v3 }
 0x45e   : > { %2094 = vst.msk [vmem:[%s3466_s14 + $0xc8] sm:$0xff] %vm578_vm0, %v2824_v7 }
 0x463   : > { %v2826_v32 = vpop.eup %2825 }
 0x464   : > { %v2828_v36 = vpop.eup %2827  ;;  %2099 = vst.msk [vmem:[%s3466_s14 + $0xf0] sm:$0xff] %vm578_vm0, %v2826_v32 }
 0x465   : > { %v2830_v9 = vpop.eup %2829  ;;  %2097 = vst.msk [vmem:[%s3466_s14 + $0xe0] sm:$0xff] %vm578_vm0, %v2828_v36 }
 0x466   : > { %v2832_v11 = vpop.eup %2831  ;;  %2100 = vst.msk [vmem:[%s3466_s14 + $0xf8] sm:$0xff] %vm578_vm0, %v2830_v9 }
 0x467   : > { %2098 = vst.msk [vmem:[%s3466_s14 + $0xe8] sm:$0xff] %vm578_vm0, %v2832_v11 }
 0x468 PF: > { %s22_s17 = sadd.s32 1, %s2839_s17  }
 0x469   : > { %p19_p4 = scmp.ge.s32.totalorder %s22_s17, 4  }
 0x46b   :  { %21 = sbr.rel (!%p19_p4) target bundleno = 1 (0x1), region = 105 }

</bundles_post_ra>
